<compile_context>
chip_gen: v7x
topology: tpu7x:2x2x1
jax: 0.10.0
libtpu: 0.0.40
codegen_flags: <defaults>
</compile_context>

<pallas_src>
import functools

import jax
import jax.numpy as jnp
from jax import lax
from jax.experimental import pallas as pl
from jax.experimental.pallas import tpu as pltpu

NEG_SLOPE = 0.1          # nn.LeakyReLU(negative_slope=0.1)
BN_EPS = 1e-3            # BatchNorm2d(eps=0.001)
LANE = 128               # TPU lane width
_PREFOLD_MAX_CIN = 64    # below this, fold taps in XLA (9x of a tiny tensor)


def _round_up(x, m):
    return (x + m - 1) // m * m


# ---------------------------------------------------------------------------
# Chip-aware tiling knobs (conservative defaults if the kind is unknown).
# ---------------------------------------------------------------------------

def _device_caps():
    kind = ""
    try:
        kind = jax.devices()[0].device_kind.lower()
    except Exception:
        pass
    if "v5 lite" in kind or "v5e" in kind or "v5lite" in kind:
        # 128x128 MXU: N=128 already saturates it; plenty of VMEM.
        return {"tn_max": 128, "block_budget": 16 << 20, "vmem_cap": 64 << 20}
    if "v6" in kind:
        # 256-wide MXU, 128 MiB VMEM.
        return {"tn_max": 256, "block_budget": 16 << 20, "vmem_cap": 64 << 20}
    # v7x (64 MiB VMEM / TensorCore) and unknown chips: conservative budgets.
    return {"tn_max": 256, "block_budget": 10 << 20, "vmem_cap": 40 << 20}


# ---------------------------------------------------------------------------
# Fused conv kernel: tap-folded K, one MXU matmul per (row-tile, col-tile),
# per-channel scale/shift epilogue (folded bias + eval-mode BN), optional
# LeakyReLU, optional fused 1x1 projection shortcut, optional identity
# residual add.  No scratch: dot result stays in registers/VMEM values.
# ---------------------------------------------------------------------------

def _conv_kernel(x_ref, w_ref, escale_ref, eshift_ref, *rest, ksize, stride,
                 hout, wout, prefolded, apply_lrelu, has_res, has_sc):
    rest = list(rest)
    xsc_ref = rest.pop(0) if has_sc else None
    res_ref = rest.pop(0) if has_res else None
    o_ref = rest.pop(0)

    rows = o_ref.shape[0]

    if prefolded:
        # Panel already folded in HBM (small-cin path): (rows, Kp).
        patch = x_ref[...]
    else:
        cin = x_ref.shape[-1]
        cdtype = x_ref.dtype
        sub = 8 * (4 // jnp.dtype(cdtype).itemsize)   # sublane packing
        slabs = []
        for t in range(ksize * ksize):                # static unroll over taps
            kh, kw = divmod(t, ksize)
            if stride == 1:
                p, qh, qw = 0, kh, kw
            else:  # stride 2: input base is parity-decomposed (space-to-depth)
                p, qh, qw = 2 * (kh % 2) + (kw % 2), kh // 2, kw // 2
            a = x_ref[p, :, qh:qh + hout, qw:qw + wout, :]  # (bn,hout,wout,cin)
            if wout % sub == 0:
                a2 = a.reshape(rows, cin)
            else:
                # TODO(synk): relayout detour for a packed reshape whose
                # second-minor (wout) is not sublane-aligned; known to lower.
                a2 = a.astype(jnp.float32).reshape(rows, cin).astype(cdtype)
            slabs.append(a2)
        if has_sc:
            # Fused 1x1 projection shortcut: its channels are extra K columns.
            slabs.append(xsc_ref[...])
        patch = slabs[0] if len(slabs) == 1 else jnp.concatenate(slabs, axis=-1)

    y = jnp.dot(patch, w_ref[...], preferred_element_type=jnp.float32)
    y = y * escale_ref[...] + eshift_ref[...]
    if apply_lrelu:
        y = jnp.where(y > 0, y, NEG_SLOPE * y)
    if has_res:
        y = y + res_ref[...].astype(jnp.float32)
    o_ref[...] = y.astype(o_ref.dtype)


def _pick_batch_tile(n, rows_per_img, per_img_bytes, fixed_bytes, budget,
                     need_multi, max_rows=1024):
    divs = [d for d in range(1, n + 1) if n % d == 0]
    valid = [d for d in divs if (d * rows_per_img) % 8 == 0] or [n]
    best = valid[0]
    for d in valid[1:]:
        if d * per_img_bytes + fixed_bytes <= budget and d * rows_per_img <= max_rows:
            best = d
    if need_multi and best == n and len(valid) > 1:
        # keep >= 2 programs on the batch axis (megacore) instead of full batch
        best = [d for d in valid if d < n][-1]
    return best


def _conv_pallas(x_in, w, escale, eshift, xsc, res, *, ksize, stride, hout,
                 wout, prefolded, apply_lrelu, out_dtype, caps):
    Kp, cout_p = w.shape
    rows_per_img = hout * wout
    itemsize = jnp.dtype(x_in.dtype).itemsize
    if prefolded:
        M = x_in.shape[0]
        N = M // rows_per_img
    else:
        P, N, Hb, Wb, cin = x_in.shape
        M = N * rows_per_img

    # out-channel tile: largest multiple of 128 dividing cout_p, chip-capped
    tn = LANE
    cand = caps["tn_max"]
    while cand >= LANE:
        if cout_p % cand == 0:
            tn = cand
            break
        cand -= LANE
    gj = cout_p // tn

    # rough per-image live-block bytes (double-buffered streams + temps)
    if prefolded:
        per_img = rows_per_img * Kp * itemsize * 2
    else:
        per_img = P * Hb * Wb * cin * itemsize * 2
        per_img += rows_per_img * Kp * itemsize          # folded patch value
        if wout % (8 * (4 // itemsize)):
            per_img += rows_per_img * cin * 4            # relayout detour temp
    per_img += rows_per_img * tn * 4                      # f32 epilogue value
    per_img += rows_per_img * tn * jnp.dtype(out_dtype).itemsize * 2
    if xsc is not None:
        per_img += rows_per_img * xsc.shape[1] * itemsize * 2
    if res is not None:
        per_img += rows_per_img * tn * jnp.dtype(res.dtype).itemsize * 2
    fixed = Kp * tn * itemsize * 2 + 6 * tn * 4

    bn = _pick_batch_tile(N, rows_per_img, per_img, fixed, caps["block_budget"],
                          need_multi=(gj == 1))
    tm = bn * rows_per_img
    gi = N // bn

    # keep whichever operand would stream more HBM bytes resident across the
    # inner grid axis (weights vs activations)
    w_bytes = Kp * cout_p * itemsize
    x_bytes = (M * Kp if prefolded else P * N * Hb * Wb * cin) * itemsize
    weights_resident = (gi - 1) * w_bytes > (gj - 1) * x_bytes
    if weights_resident:
        grid = (gj, gi)
        ordered = lambda f: (lambda a, b: f(b, a))   # grid point = (j, i)
    else:
        grid = (gi, gj)
        ordered = lambda f: f                        # grid point = (i, j)

    if prefolded:
        x_spec = pl.BlockSpec((tm, Kp), ordered(lambda i, j: (i, 0)))
    else:
        x_spec = pl.BlockSpec((P, bn, Hb, Wb, cin),
                              ordered(lambda i, j: (0, i, 0, 0, 0)))
    in_specs = [x_spec,
                pl.BlockSpec((Kp, tn), ordered(lambda i, j: (0, j))),
                pl.BlockSpec((1, tn), ordered(lambda i, j: (0, j))),
                pl.BlockSpec((1, tn), ordered(lambda i, j: (0, j)))]
    args = [x_in, w,
            escale.reshape(1, cout_p).astype(jnp.float32),
            eshift.reshape(1, cout_p).astype(jnp.float32)]
    if xsc is not None:
        in_specs.append(pl.BlockSpec((tm, xsc.shape[1]),
                                     ordered(lambda i, j: (i, 0))))
        args.append(xsc)
    if res is not None:
        in_specs.append(pl.BlockSpec((tm, tn), ordered(lambda i, j: (i, j))))
        args.append(res)

    est = bn * per_img + fixed
    vmem_limit = int(min(caps["vmem_cap"], max(32 << 20, 2 * est + (8 << 20))))

    kernel = functools.partial(
        _conv_kernel, ksize=ksize, stride=stride, hout=hout, wout=wout,
        prefolded=prefolded, apply_lrelu=apply_lrelu,
        has_res=res is not None, has_sc=xsc is not None)

    return pl.pallas_call(
        kernel,
        grid=grid,
        in_specs=in_specs,
        out_specs=pl.BlockSpec((tm, tn), ordered(lambda i, j: (i, j))),
        out_shape=jax.ShapeDtypeStruct((M, cout_p), out_dtype),
        compiler_params=pltpu.CompilerParams(
            dimension_semantics=("parallel", "parallel"),
            vmem_limit_bytes=vmem_limit),
    )(*args)


# ---------------------------------------------------------------------------
# Plain-JAX glue: padding, parity split, tap-folded weight packing, BN fold.
# ---------------------------------------------------------------------------

def _pad_channels(x, cp):
    c = x.shape[-1]
    if c == cp:
        return x
    return jnp.pad(x, [(0, 0)] * (x.ndim - 1) + [(0, cp - c)])


def _conv3_base(x_act, stride, dtype):
    """Spatial pad (k=3, p=1); for stride 2 also split into 4 stride-1 parity
    views (space-to-depth).  Returns (P, N, Hb, Wb, C) in the compute dtype."""
    # TODO(synk): padding is still a standalone HBM pass; in-kernel halo
    # masking of the border taps would remove it.
    xp = jnp.pad(x_act, ((0, 0), (1, 1), (1, 1), (0, 0)))
    if stride == 1:
        base = xp[None]
    else:
        assert stride == 2 and x_act.shape[1] % 2 == 0 and x_act.shape[2] % 2 == 0
        base = jnp.stack([xp[:, ph::2, pw::2, :]
                          for ph in (0, 1) for pw in (0, 1)], axis=0)
    return base.astype(dtype)


def _im2col_hbm(x_act, stride, hout, wout, kp, dtype):
    """Small-cin path: tap-folded (M, Kp) panel built in plain XLA (9x of a
    tiny tensor beats padding cin to 128 per tap)."""
    n, _, _, cin = x_act.shape
    xp = jnp.pad(x_act, ((0, 0), (1, 1), (1, 1), (0, 0)))
    cols = [xp[:, kh:kh + stride * hout:stride, kw:kw + stride * wout:stride, :]
            for kh in range(3) for kw in range(3)]
    panel = jnp.concatenate(cols, axis=-1).reshape(n * hout * wout, 9 * cin)
    if kp > 9 * cin:
        panel = jnp.pad(panel, ((0, 0), (0, kp - 9 * cin)))
    return panel.astype(dtype)


def _w_folded(w_oihw, cin_k, cout_p, k_pad_to=None):
    """OIHW -> tap-folded ((kh*kw*cin_k)[+pad], cout_p) matmul weight."""
    cout, cin, kh, kw = w_oihw.shape
    w = jnp.transpose(w_oihw, (2, 3, 1, 0))            # (kh, kw, cin, cout)
    if cin_k != cin:
        w = jnp.pad(w, ((0, 0), (0, 0), (0, cin_k - cin), (0, 0)))
    w = w.reshape(kh * kw * cin_k, cout)
    if k_pad_to is not None and k_pad_to > w.shape[0]:
        w = jnp.pad(w, ((0, k_pad_to - w.shape[0]), (0, 0)))
    if cout_p != cout:
        w = jnp.pad(w, ((0, 0), (0, cout_p - cout)))
    return w


def _bn_fold(gamma, beta, mean, var):
    scale = gamma / jnp.sqrt(var + BN_EPS)
    return scale, beta - mean * scale


def _leaky(y):
    return jnp.where(y > 0, y, NEG_SLOPE * y)


# ---------------------------------------------------------------------------
# BasicBlock forward (eval-mode BN; mirrors the TorchSSL branching exactly)
# ---------------------------------------------------------------------------

def basic_block_forward_nhwc(x_nhwc, params, *, stride,
                             activate_before_residual=False, drop_rate=0.0,
                             compute_dtype=jnp.bfloat16):
    caps = _device_caps()
    N, H, W, cin = x_nhwc.shape
    cout = params["conv1_w"].shape[0]
    equal = cin == cout
    assert (not equal) or stride == 1, \
        "equalInOut with stride>1 is unsupported (identity residual shape mismatch)"
    hout, wout = H // stride, W // stride
    cout_p = _round_up(cout, LANE)

    x = x_nhwc.astype(jnp.float32)
    s1, t1 = _bn_fold(params["bn1_gamma"], params["bn1_beta"],
                      params["bn1_mean"], params["bn1_var"])
    s2, t2 = _bn_fold(params["bn2_gamma"], params["bn2_beta"],
                      params["bn2_mean"], params["bn2_var"])

    # bn1 + LeakyReLU fuse into conv1's input-prep fusion.  In the (not
    # equalInOut, not activate_before_residual) branch the TorchSSL module
    # feeds RAW x to both conv1 and the shortcut (bn1/relu1 output discarded).
    need_act = equal or activate_before_residual
    x_act = _leaky(x * s1 + t1) if need_act else None
    conv1_in = x_act if need_act else x

    # ---- conv1 (3x3, stride s) -> epilogue: +bias, bn2, LeakyReLU ----------
    if cin <= _PREFOLD_MAX_CIN:
        k1p = _round_up(9 * cin, LANE)
        x1 = _im2col_hbm(conv1_in, stride, hout, wout, k1p, compute_dtype)
        w1 = _w_folded(params["conv1_w"], cin, cout_p, k_pad_to=k1p)
        prefold1 = True
    else:
        cin_k = _round_up(cin, LANE)
        x1 = _conv3_base(_pad_channels(conv1_in, cin_k), stride, compute_dtype)
        w1 = _w_folded(params["conv1_w"], cin_k, cout_p)
        prefold1 = False
    esc1 = jnp.pad(s2, (0, cout_p - cout))
    esh1 = jnp.pad(params["conv1_b"] * s2 + t2, (0, cout_p - cout))
    h = _conv_pallas(x1, w1.astype(compute_dtype), esc1, esh1, None, None,
                     ksize=3, stride=stride, hout=hout, wout=wout,
                     prefolded=prefold1, apply_lrelu=True,
                     out_dtype=compute_dtype, caps=caps)       # (M, cout_p)

    # TODO(synk): F.dropout for drop_rate > 0 (training mode) not implemented;
    # drop_rate = 0.0 (the module default) is an identity.
    del drop_rate

    # ---- conv2 (3x3, stride 1) + bias + residual, one fused kernel ---------
    base2 = _conv3_base(h.reshape(N, hout, wout, cout_p), 1, compute_dtype)
    w2 = _w_folded(params["conv2_w"], cout_p, cout_p)          # (9*cout_p, cout_p)
    esh2 = params["conv2_b"]
    if equal:
        xsc = None
        wfull = w2
        # identity residual: raw x, streamed as bf16, added in f32 in-kernel
        res = _pad_channels(x, cout_p).astype(compute_dtype).reshape(
            N * H * W, cout_p)
    else:
        # fused 1x1 projection shortcut: extra K columns of conv2's matmul
        sc_src = x_act if activate_before_residual else x
        csc_p = _round_up(cin, LANE)
        xsc = _pad_channels(sc_src[:, ::stride, ::stride, :], csc_p)
        xsc = xsc.astype(compute_dtype).reshape(N * hout * wout, csc_p)
        wsc = jnp.transpose(params["convsc_w"].reshape(cout, cin), (1, 0))
        wsc = jnp.pad(wsc, ((0, csc_p - cin), (0, cout_p - cout)))
        wfull = jnp.concatenate([w2, wsc], axis=0)
        esh2 = esh2 + params["convsc_b"]
        res = None
    y = _conv_pallas(base2, wfull.astype(compute_dtype),
                     jnp.ones((cout_p,), jnp.float32),
                     jnp.pad(esh2, (0, cout_p - cout)),
                     xsc, res, ksize=3, stride=1, hout=hout, wout=wout,
                     prefolded=False, apply_lrelu=False,
                     out_dtype=jnp.float32, caps=caps)
    return y.reshape(N, hout, wout, cout_p)[..., :cout]


def basic_block_forward(x_nchw, params, *, stride, activate_before_residual=False,
                        drop_rate=0.0, compute_dtype=jnp.bfloat16):
    # TODO(synk): when chaining blocks, keep activations NHWC end-to-end and do
    # a single NCHW<->NHWC layout change at the model boundary instead of here.
    x = jnp.transpose(x_nchw, (0, 2, 3, 1))
    y = basic_block_forward_nhwc(x, params, stride=stride,
                                 activate_before_residual=activate_before_residual,
                                 drop_rate=drop_rate, compute_dtype=compute_dtype)
    return jnp.transpose(y, (0, 3, 1, 2))


# ---------------------------------------------------------------------------
# Parameters and a pure-JAX f32 reference (correctness check only)
# ---------------------------------------------------------------------------

def init_params(key, in_planes, out_planes):
    ks = jax.random.split(key, 16)
    f32 = jnp.float32
    return {
        "bn1_gamma": 1.0 + 0.1 * jax.random.normal(ks[0], (in_planes,), f32),
        "bn1_beta": 0.1 * jax.random.normal(ks[1], (in_planes,), f32),
        "bn1_mean": 0.1 * jax.random.normal(ks[2], (in_planes,), f32),
        "bn1_var": jax.random.uniform(ks[3], (in_planes,), f32, 0.5, 1.5),
        "conv1_w": 0.1 * jax.random.normal(ks[4], (out_planes, in_planes, 3, 3), f32),
        "conv1_b": 0.1 * jax.random.normal(ks[5], (out_planes,), f32),
        "bn2_gamma": 1.0 + 0.1 * jax.random.normal(ks[6], (out_planes,), f32),
        "bn2_beta": 0.1 * jax.random.normal(ks[7], (out_planes,), f32),
        "bn2_mean": 0.1 * jax.random.normal(ks[8], (out_planes,), f32),
        "bn2_var": jax.random.uniform(ks[9], (out_planes,), f32, 0.5, 1.5),
        "conv2_w": 0.1 * jax.random.normal(ks[10], (out_planes, out_planes, 3, 3), f32),
        "conv2_b": 0.1 * jax.random.normal(ks[11], (out_planes,), f32),
        "convsc_w": 0.1 * jax.random.normal(ks[12], (out_planes, in_planes, 1, 1), f32),
        "convsc_b": 0.1 * jax.random.normal(ks[13], (out_planes,), f32),
    }


def _ref_forward(x_nchw, params, *, stride, activate_before_residual=False):
    def bn_lrelu(x, g, b, m, v):
        y = (x - m[None, :, None, None]) * (g / jnp.sqrt(v + BN_EPS))[None, :, None, None] \
            + b[None, :, None, None]
        return jnp.where(y > 0, y, NEG_SLOPE * y)

    def conv(x, w, b, s, pad):
        y = lax.conv_general_dilated(x, w, (s, s), [(pad, pad), (pad, pad)],
                                     dimension_numbers=("NCHW", "OIHW", "NCHW"))
        return y + b[None, :, None, None]

    in_planes = x_nchw.shape[1]
    out_planes = params["conv1_w"].shape[0]
    equal = in_planes == out_planes
    x = x_nchw
    if (not equal) and activate_before_residual:
        x = bn_lrelu(x, params["bn1_gamma"], params["bn1_beta"],
                     params["bn1_mean"], params["bn1_var"])
        out = x
    else:
        out = bn_lrelu(x, params["bn1_gamma"], params["bn1_beta"],
                       params["bn1_mean"], params["bn1_var"])
    out = conv(out if equal else x, params["conv1_w"], params["conv1_b"], stride, 1)
    out = bn_lrelu(out, params["bn2_gamma"], params["bn2_beta"],
                   params["bn2_mean"], params["bn2_var"])
    out = conv(out, params["conv2_w"], params["conv2_b"], 1, 1)
    sc = x if equal else conv(x, params["convsc_w"], params["convsc_b"], stride, 0)
    return sc + out


if __name__ == "__main__":
    key = jax.random.PRNGKey(0)
    kx, kp1, kp2 = jax.random.split(key, 3)

    x = jax.random.normal(kx, (2, 4, 16, 16), dtype=jnp.float32)

    # Case 1: in != out -> fused projection shortcut, stride 2, pre-activation.
    params = init_params(kp1, 4, 8)
    fwd1 = jax.jit(functools.partial(basic_block_forward, stride=2,
                                     activate_before_residual=True))
    y = jax.block_until_ready(fwd1(x, params))
    y_ref = _ref_forward(x, params, stride=2, activate_before_residual=True)
    assert y.shape == (2, 8, 8, 8), y.shape
    if not jnp.allclose(y, y_ref, rtol=5e-2, atol=5e-2):
        raise SystemExit("mismatch vs reference (projection case), max abs err "
                         f"{float(jnp.max(jnp.abs(y - y_ref)))}")

    # Case 2: equalInOut -> identity shortcut, stride 1.
    params2 = init_params(kp2, 4, 4)
    fwd2 = jax.jit(functools.partial(basic_block_forward, stride=1,
                                     activate_before_residual=False))
    y2 = jax.block_until_ready(fwd2(x, params2))
    y2_ref = _ref_forward(x, params2, stride=1, activate_before_residual=False)
    assert y2.shape == (2, 4, 16, 16), y2.shape
    if not jnp.allclose(y2, y2_ref, rtol=5e-2, atol=5e-2):
        raise SystemExit("mismatch vs reference (identity case), max abs err "
                         f"{float(jnp.max(jnp.abs(y2 - y2_ref)))}")

    print("KERNEL_OK")
</pallas_src>

<mosaic_0001>
module attributes {stable_mosaic.version = 11 : i64} {
  func.func @_conv_kernel(%arg0: i32, %arg1: i32, %arg2: memref<64x128xbf16, #tpu.memory_space<vmem>>, %arg3: memref<128x128xbf16, #tpu.memory_space<vmem>>, %arg4: memref<1x128xf32, #tpu.memory_space<vmem>>, %arg5: memref<1x128xf32, #tpu.memory_space<vmem>>, %arg6: memref<64x128xbf16, #tpu.memory_space<vmem>>) attributes {dimension_semantics = [#tpu.dimension_semantics<parallel>, #tpu.dimension_semantics<parallel>], iteration_bounds = array<i64: 1, 2>, scalar_prefetch = 0 : i64, scratch_operands = 0 : i64, tpu.core_type = #tpu.core_type<tc>, window_params = [{transform_indices = @transform_0, window_bounds = array<i64: 64, 128>}, {transform_indices = @transform_1, window_bounds = array<i64: 128, 128>}, {transform_indices = @transform_2, window_bounds = array<i64: 1, 128>}, {transform_indices = @transform_3, window_bounds = array<i64: 1, 128>}, {transform_indices = @transform_4, window_bounds = array<i64: 64, 128>}]} {
    %c0 = arith.constant 0 : index
    %c0_0 = arith.constant 0 : index
    %0 = vector.load %arg2[%c0, %c0_0] : memref<64x128xbf16, #tpu.memory_space<vmem>>, vector<64x128xbf16>
    %c0_1 = arith.constant 0 : index
    %c0_2 = arith.constant 0 : index
    %1 = vector.load %arg3[%c0_1, %c0_2] : memref<128x128xbf16, #tpu.memory_space<vmem>>, vector<128x128xbf16>
    %cst = arith.constant dense<0.000000e+00> : vector<64x128xf32>
    %2 = tpu.matmul %0, %1, %cst {dimension_numbers = #tpu.dot_dimension_numbers<[1], [0], [0], [1], [0, 0, 1, 1], [], []>} : vector<64x128xbf16>, vector<128x128xbf16>, vector<64x128xf32> -> vector<64x128xf32>
    %c0_3 = arith.constant 0 : index
    %c0_4 = arith.constant 0 : index
    %3 = vector.load %arg4[%c0_3, %c0_4] : memref<1x128xf32, #tpu.memory_space<vmem>>, vector<1x128xf32>
    %4 = vector.broadcast %3 : vector<1x128xf32> to vector<64x128xf32>
    %5 = arith.mulf %2, %4 : vector<64x128xf32>
    %c0_5 = arith.constant 0 : index
    %c0_6 = arith.constant 0 : index
    %6 = vector.load %arg5[%c0_5, %c0_6] : memref<1x128xf32, #tpu.memory_space<vmem>>, vector<1x128xf32>
    %7 = vector.broadcast %6 : vector<1x128xf32> to vector<64x128xf32>
    %8 = arith.addf %5, %7 : vector<64x128xf32>
    %cst_7 = arith.constant 0.000000e+00 : f32
    %9 = vector.broadcast %cst_7 : f32 to vector<64x128xf32>
    %10 = arith.cmpf ogt, %8, %9 : vector<64x128xf32>
    %cst_8 = arith.constant 1.000000e-01 : f32
    %11 = vector.broadcast %cst_8 : f32 to vector<64x128xf32>
    %12 = arith.mulf %11, %8 : vector<64x128xf32>
    %13 = arith.select %10, %8, %12 : vector<64x128xi1>, vector<64x128xf32>
    %14 = arith.truncf %13 : vector<64x128xf32> to vector<64x128xbf16>
    %c0_9 = arith.constant 0 : index
    %c0_10 = arith.constant 0 : index
    %15 = vector.load %arg6[%c0_9, %c0_10] : memref<64x128xbf16, #tpu.memory_space<vmem>>, vector<64x128xbf16>
    tpu.vector_store %arg6[%c0_9, %c0_10], %14 {strides = array<i32>} : memref<64x128xbf16, #tpu.memory_space<vmem>>, vector<64x128xbf16>,
    return
  }
  func.func @transform_0(%arg0: i32, %arg1: i32) -> (i32, i32) {
    %c0_i32 = arith.constant 0 : i32
    %c0_i32_0 = arith.constant 0 : i32
    return %arg1, %c0_i32 : i32, i32
  }
  func.func @transform_1(%arg0: i32, %arg1: i32) -> (i32, i32) {
    %c0_i32 = arith.constant 0 : i32
    %c0_i32_0 = arith.constant 0 : i32
    return %c0_i32, %arg0 : i32, i32
  }
  func.func @transform_2(%arg0: i32, %arg1: i32) -> (i32, i32) {
    %c0_i32 = arith.constant 0 : i32
    %c0_i32_0 = arith.constant 0 : i32
    return %c0_i32, %arg0 : i32, i32
  }
  func.func @transform_3(%arg0: i32, %arg1: i32) -> (i32, i32) {
    %c0_i32 = arith.constant 0 : i32
    %c0_i32_0 = arith.constant 0 : i32
    return %c0_i32, %arg0 : i32, i32
  }
  func.func @transform_4(%arg0: i32, %arg1: i32) -> (i32, i32) {
    %c0_i32 = arith.constant 0 : i32
    return %arg1, %arg0 : i32, i32
  }
}

module attributes {stable_mosaic.version = 11 : i64} {
  func.func @_conv_kernel(%arg0: i32, %arg1: i32, %arg2: memref<1x1x10x10x128xbf16, #tpu.memory_space<vmem>>, %arg3: memref<1280x128xbf16, #tpu.memory_space<vmem>>, %arg4: memref<1x128xf32, #tpu.memory_space<vmem>>, %arg5: memref<1x128xf32, #tpu.memory_space<vmem>>, %arg6: memref<64x128xbf16, #tpu.memory_space<vmem>>, %arg7: memref<64x128xf32, #tpu.memory_space<vmem>>) attributes {dimension_semantics = [#tpu.dimension_semantics<parallel>, #tpu.dimension_semantics<parallel>], iteration_bounds = array<i64: 1, 2>, scalar_prefetch = 0 : i64, scratch_operands = 0 : i64, tpu.core_type = #tpu.core_type<tc>, window_params = [{transform_indices = @transform_0, window_bounds = array<i64: 1, 1, 10, 10, 128>}, {transform_indices = @transform_1, window_bounds = array<i64: 1280, 128>}, {transform_indices = @transform_2, window_bounds = array<i64: 1, 128>}, {transform_indices = @transform_3, window_bounds = array<i64: 1, 128>}, {transform_indices = @transform_4, window_bounds = array<i64: 64, 128>}, {transform_indices = @transform_5, window_bounds = array<i64: 64, 128>}]} {
    %c0 = arith.constant 0 : index
    %c0_0 = arith.constant 0 : index
    %c0_1 = arith.constant 0 : index
    %c0_2 = arith.constant 0 : index
    %c0_3 = arith.constant 0 : index
    %0 = vector.load %arg2[%c0, %c0_0, %c0_1, %c0_2, %c0_3] : memref<1x1x10x10x128xbf16, #tpu.memory_space<vmem>>, vector<1x1x8x8x128xbf16>
    %1 = vector.shape_cast %0 : vector<1x1x8x8x128xbf16> to vector<1x8x8x128xbf16>
    %2 = arith.extf %1 : vector<1x8x8x128xbf16> to vector<1x8x8x128xf32>
    %3 = vector.shape_cast %2 : vector<1x8x8x128xf32> to vector<64x128xf32>
    %4 = arith.truncf %3 : vector<64x128xf32> to vector<64x128xbf16>
    %c0_4 = arith.constant 0 : index
    %c0_5 = arith.constant 0 : index
    %c0_6 = arith.constant 0 : index
    %c1 = arith.constant 1 : index
    %c0_7 = arith.constant 0 : index
    %5 = vector.load %arg2[%c0_4, %c0_5, %c0_6, %c1, %c0_7] : memref<1x1x10x10x128xbf16, #tpu.memory_space<vmem>>, vector<1x1x8x8x128xbf16>
    %6 = vector.shape_cast %5 : vector<1x1x8x8x128xbf16> to vector<1x8x8x128xbf16>
    %7 = arith.extf %6 : vector<1x8x8x128xbf16> to vector<1x8x8x128xf32>
    %8 = vector.shape_cast %7 : vector<1x8x8x128xf32> to vector<64x128xf32>
    %9 = arith.truncf %8 : vector<64x128xf32> to vector<64x128xbf16>
    %c0_8 = arith.constant 0 : index
    %c0_9 = arith.constant 0 : index
    %c0_10 = arith.constant 0 : index
    %c2 = arith.constant 2 : index
    %c0_11 = arith.constant 0 : index
    %10 = vector.load %arg2[%c0_8, %c0_9, %c0_10, %c2, %c0_11] : memref<1x1x10x10x128xbf16, #tpu.memory_space<vmem>>, vector<1x1x8x8x128xbf16>
    %11 = vector.shape_cast %10 : vector<1x1x8x8x128xbf16> to vector<1x8x8x128xbf16>
    %12 = arith.extf %11 : vector<1x8x8x128xbf16> to vector<1x8x8x128xf32>
    %13 = vector.shape_cast %12 : vector<1x8x8x128xf32> to vector<64x128xf32>
    %14 = arith.truncf %13 : vector<64x128xf32> to vector<64x128xbf16>
    %c0_12 = arith.constant 0 : index
    %c0_13 = arith.constant 0 : index
    %c1_14 = arith.constant 1 : index
    %c0_15 = arith.constant 0 : index
    %c0_16 = arith.constant 0 : index
    %15 = vector.load %arg2[%c0_12, %c0_13, %c1_14, %c0_15, %c0_16] : memref<1x1x10x10x128xbf16, #tpu.memory_space<vmem>>, vector<1x1x8x8x128xbf16>
    %16 = vector.shape_cast %15 : vector<1x1x8x8x128xbf16> to vector<1x8x8x128xbf16>
    %17 = arith.extf %16 : vector<1x8x8x128xbf16> to vector<1x8x8x128xf32>
    %18 = vector.shape_cast %17 : vector<1x8x8x128xf32> to vector<64x128xf32>
    %19 = arith.truncf %18 : vector<64x128xf32> to vector<64x128xbf16>
    %c0_17 = arith.constant 0 : index
    %c0_18 = arith.constant 0 : index
    %c1_19 = arith.constant 1 : index
    %c1_20 = arith.constant 1 : index
    %c0_21 = arith.constant 0 : index
    %20 = vector.load %arg2[%c0_17, %c0_18, %c1_19, %c1_20, %c0_21] : memref<1x1x10x10x128xbf16, #tpu.memory_space<vmem>>, vector<1x1x8x8x128xbf16>
    %21 = vector.shape_cast %20 : vector<1x1x8x8x128xbf16> to vector<1x8x8x128xbf16>
    %22 = arith.extf %21 : vector<1x8x8x128xbf16> to vector<1x8x8x128xf32>
    %23 = vector.shape_cast %22 : vector<1x8x8x128xf32> to vector<64x128xf32>
    %24 = arith.truncf %23 : vector<64x128xf32> to vector<64x128xbf16>
    %c0_22 = arith.constant 0 : index
    %c0_23 = arith.constant 0 : index
    %c1_24 = arith.constant 1 : index
    %c2_25 = arith.constant 2 : index
    %c0_26 = arith.constant 0 : index
    %25 = vector.load %arg2[%c0_22, %c0_23, %c1_24, %c2_25, %c0_26] : memref<1x1x10x10x128xbf16, #tpu.memory_space<vmem>>, vector<1x1x8x8x128xbf16>
    %26 = vector.shape_cast %25 : vector<1x1x8x8x128xbf16> to vector<1x8x8x128xbf16>
    %27 = arith.extf %26 : vector<1x8x8x128xbf16> to vector<1x8x8x128xf32>
    %28 = vector.shape_cast %27 : vector<1x8x8x128xf32> to vector<64x128xf32>
    %29 = arith.truncf %28 : vector<64x128xf32> to vector<64x128xbf16>
    %c0_27 = arith.constant 0 : index
    %c0_28 = arith.constant 0 : index
    %c2_29 = arith.constant 2 : index
    %c0_30 = arith.constant 0 : index
    %c0_31 = arith.constant 0 : index
    %30 = vector.load %arg2[%c0_27, %c0_28, %c2_29, %c0_30, %c0_31] : memref<1x1x10x10x128xbf16, #tpu.memory_space<vmem>>, vector<1x1x8x8x128xbf16>
    %31 = vector.shape_cast %30 : vector<1x1x8x8x128xbf16> to vector<1x8x8x128xbf16>
    %32 = arith.extf %31 : vector<1x8x8x128xbf16> to vector<1x8x8x128xf32>
    %33 = vector.shape_cast %32 : vector<1x8x8x128xf32> to vector<64x128xf32>
    %34 = arith.truncf %33 : vector<64x128xf32> to vector<64x128xbf16>
    %c0_32 = arith.constant 0 : index
    %c0_33 = arith.constant 0 : index
    %c2_34 = arith.constant 2 : index
    %c1_35 = arith.constant 1 : index
    %c0_36 = arith.constant 0 : index
    %35 = vector.load %arg2[%c0_32, %c0_33, %c2_34, %c1_35, %c0_36] : memref<1x1x10x10x128xbf16, #tpu.memory_space<vmem>>, vector<1x1x8x8x128xbf16>
    %36 = vector.shape_cast %35 : vector<1x1x8x8x128xbf16> to vector<1x8x8x128xbf16>
    %37 = arith.extf %36 : vector<1x8x8x128xbf16> to vector<1x8x8x128xf32>
    %38 = vector.shape_cast %37 : vector<1x8x8x128xf32> to vector<64x128xf32>
    %39 = arith.truncf %38 : vector<64x128xf32> to vector<64x128xbf16>
    %c0_37 = arith.constant 0 : index
    %c0_38 = arith.constant 0 : index
    %c2_39 = arith.constant 2 : index
    %c2_40 = arith.constant 2 : index
    %c0_41 = arith.constant 0 : index
    %40 = vector.load %arg2[%c0_37, %c0_38, %c2_39, %c2_40, %c0_41] : memref<1x1x10x10x128xbf16, #tpu.memory_space<vmem>>, vector<1x1x8x8x128xbf16>
    %41 = vector.shape_cast %40 : vector<1x1x8x8x128xbf16> to vector<1x8x8x128xbf16>
    %42 = arith.extf %41 : vector<1x8x8x128xbf16> to vector<1x8x8x128xf32>
    %43 = vector.shape_cast %42 : vector<1x8x8x128xf32> to vector<64x128xf32>
    %44 = arith.truncf %43 : vector<64x128xf32> to vector<64x128xbf16>
    %c0_42 = arith.constant 0 : index
    %c0_43 = arith.constant 0 : index
    %45 = vector.load %arg6[%c0_42, %c0_43] : memref<64x128xbf16, #tpu.memory_space<vmem>>, vector<64x128xbf16>
    %46 = tpu.concatenate %4, %9, %14, %19, %24, %29, %34, %39, %44, %45 in 1 : vector<64x128xbf16>, vector<64x128xbf16>, vector<64x128xbf16>, vector<64x128xbf16>, vector<64x128xbf16>, vector<64x128xbf16>, vector<64x128xbf16>, vector<64x128xbf16>, vector<64x128xbf16>, vector<64x128xbf16> -> vector<64x1280xbf16>
    %c0_44 = arith.constant 0 : index
    %c0_45 = arith.constant 0 : index
    %47 = vector.load %arg3[%c0_44, %c0_45] : memref<1280x128xbf16, #tpu.memory_space<vmem>>, vector<1280x128xbf16>
    %cst = arith.constant dense<0.000000e+00> : vector<64x128xf32>
    %48 = tpu.matmul %46, %47, %cst {dimension_numbers = #tpu.dot_dimension_numbers<[1], [0], [0], [1], [0, 0, 1, 1], [], []>} : vector<64x1280xbf16>, vector<1280x128xbf16>, vector<64x128xf32> -> vector<64x128xf32>
    %c0_46 = arith.constant 0 : index
    %c0_47 = arith.constant 0 : index
    %49 = vector.load %arg4[%c0_46, %c0_47] : memref<1x128xf32, #tpu.memory_space<vmem>>, vector<1x128xf32>
    %50 = vector.broadcast %49 : vector<1x128xf32> to vector<64x128xf32>
    %51 = arith.mulf %48, %50 : vector<64x128xf32>
    %c0_48 = arith.constant 0 : index
    %c0_49 = arith.constant 0 : index
    %52 = vector.load %arg5[%c0_48, %c0_49] : memref<1x128xf32, #tpu.memory_space<vmem>>, vector<1x128xf32>
    %53 = vector.broadcast %52 : vector<1x128xf32> to vector<64x128xf32>
    %54 = arith.addf %51, %53 : vector<64x128xf32>
    %c0_50 = arith.constant 0 : index
    %c0_51 = arith.constant 0 : index
    %55 = vector.load %arg7[%c0_50, %c0_51] : memref<64x128xf32, #tpu.memory_space<vmem>>, vector<64x128xf32>
    tpu.vector_store %arg7[%c0_50, %c0_51], %54 {strides = array<i32>} : memref<64x128xf32, #tpu.memory_space<vmem>>, vector<64x128xf32>,
    return
  }
  func.func @transform_0(%arg0: i32, %arg1: i32) -> (i32, i32, i32, i32, i32) {
    %c0_i32 = arith.constant 0 : i32
    %c0_i32_0 = arith.constant 0 : i32
    %c0_i32_1 = arith.constant 0 : i32
    %c0_i32_2 = arith.constant 0 : i32
    %c0_i32_3 = arith.constant 0 : i32
    return %c0_i32, %arg1, %c0_i32_0, %c0_i32_1, %c0_i32_2 : i32, i32, i32, i32, i32
  }
  func.func @transform_1(%arg0: i32, %arg1: i32) -> (i32, i32) {
    %c0_i32 = arith.constant 0 : i32
    %c0_i32_0 = arith.constant 0 : i32
    return %c0_i32, %arg0 : i32, i32
  }
  func.func @transform_2(%arg0: i32, %arg1: i32) -> (i32, i32) {
    %c0_i32 = arith.constant 0 : i32
    %c0_i32_0 = arith.constant 0 : i32
    return %c0_i32, %arg0 : i32, i32
  }
  func.func @transform_3(%arg0: i32, %arg1: i32) -> (i32, i32) {
    %c0_i32 = arith.constant 0 : i32
    %c0_i32_0 = arith.constant 0 : i32
    return %c0_i32, %arg0 : i32, i32
  }
  func.func @transform_4(%arg0: i32, %arg1: i32) -> (i32, i32) {
    %c0_i32 = arith.constant 0 : i32
    %c0_i32_0 = arith.constant 0 : i32
    return %arg1, %c0_i32 : i32, i32
  }
  func.func @transform_5(%arg0: i32, %arg1: i32) -> (i32, i32) {
    %c0_i32 = arith.constant 0 : i32
    return %arg1, %arg0 : i32, i32
  }
}

</mosaic_0001>

<bundles_post_ra>
// kernel: basic_block_forward.2
= control target key start
LH: loop header
LB: loop body
LE: loop exit
PB: predicated region body
PF: predicated region fallthrough
CT: control target
= control target key end

     0   :  { %s840_s15 = smov 0   ;;  %s842_s16 = smov 0   ;;  %s918_s0 = inlined_call_operand.vmem [shape: bf16[128,128], index: 0, kind: input, shape index: {}]   ;;  %s919_s1 = inlined_call_operand.vmem [shape: bf16[128,128], index: 1, kind: input, shape index: {}]   ;;  %s920_s2 = inlined_call_operand.vmem [shape: f32[1,128], index: 2, kind: input, shape index: {}]   ;;  %s921_s3 = inlined_call_operand.vmem [shape: f32[1,128], index: 3, kind: input, shape index: {}]   ;;  %s922_s4 = inlined_call_operand.vmem [shape: bf16[128,128], index: 4, kind: output, shape index: {}]  }
   0x1   :  { %s844_s17 = smov 0  }
   0x2 LB: > { %s23_s18 = sadd.s32 1, %s809_s16  ;;  %p643_p0 = scmp.ge.s32.totalorder %s813_s17, 1  ;;  %s813_s17 = sphi %s844_s17, %s14_s17   ;;  %s809_s16 = sphi %s842_s16, %s924_s16   ;;  %s805_s15 = sphi %s840_s15, %s923_s15  }
   0x3   : > { %p24_p1 = scmp.ge.s32.totalorder %s23_s18, 2  ;;  %p202_p2 = scmp.lt.s32.totalorder %s813_s17, 3 }
   0x5   : > { %s926_s18 = smov (%p24_p1, %s23_s18), 0  ;;  %p203_p3 = pnand %p643_p0, %p202_p2 }
   0x6   : > { %v779_v0 = vld [vmem:[%s919_s1] sm:$0xff] (!%p203_p3)   ;;  %s644_s21 = sshll.u32 (!%p203_p3), %s805_s15, 3  ;;  %v780_v1 = vld [vmem:[%s919_s1 + $0x8] sm:$0xff] (!%p203_p3)   ;;  %v781_v2 = vld [vmem:[%s919_s1 + $0x10] sm:$0xff] (!%p203_p3)  }
   0x7   : > { %206 = sbr.rel (%p203_p3) target bundleno = 266 (0x10a), region = 36  ;;  %p242_p4 = scmp.lt.s32.totalorder (!%p203_p3), %s644_s21, 15  ;;  %715 = vmatprep.subr.bf16.mxu0 (!%p203_p3), %v779_v0  ;;  %739 = vmatprep.subr.bf16.mxu1 (!%p203_p3), %v779_v0  ;;  %v782_v3 = vld [vmem:[%s919_s1 + $0x18] sm:$0xff] (!%p203_p3)   ;;  %v783_v6 = vld [vmem:[%s919_s1 + $0x20] sm:$0xff] (!%p203_p3)   ;;  %v784_v7 = vld [vmem:[%s919_s1 + $0x28] sm:$0xff] (!%p203_p3)  }
   0x8   : > { %716 = vmatpush3.bf16.msra.mxu0 (!%p203_p3), %v779_v0  ;;  %747 = vmatpush3.bf16.msra.mxu1 (!%p203_p3), %v779_v0  ;;  %v785_v8 = vld [vmem:[%s919_s1 + $0x30] sm:$0xff] (!%p203_p3)   ;;  %v786_v9 = vld [vmem:[%s919_s1 + $0x38] sm:$0xff] (!%p203_p3)   ;;  %v660_v12 = vld [vmem:[%s920_s2] ss:$0 sm:$0xff] (!%p203_p3) }
   0x9   : > { %717 = vmatprep.subr.bf16.mxu0 (!%p203_p3), %v780_v1  ;;  %740 = vmatprep.subr.bf16.mxu1 (!%p203_p3), %v780_v1  ;;  %v661_v14 = vld [vmem:[%s921_s3] ss:$0 sm:$0xff] (!%p203_p3) }
   0xc   : > { %718 = vmatpush3.bf16.msra.mxu0 (!%p203_p3), %v780_v1  ;;  %748 = vmatpush3.bf16.msra.mxu1 (!%p203_p3), %v780_v1 }
   0xd   : > { %719 = vmatprep.subr.bf16.mxu0 (!%p203_p3), %v781_v2  ;;  %741 = vmatprep.subr.bf16.mxu1 (!%p203_p3), %v781_v2 }
   0xe   : > { %s928_s21 = smov (!%p242_p4, %s644_s21), 15 }
   0xf   : > { %s645_s26 = sshll.u32 %s928_s21, 2 }
  0x10   : > { %s875_s29 = scalar_lea.vmem %s918_s0, %s645_s26  ;;  %720 = vmatpush3.bf16.msra.mxu0 %v781_v2  ;;  %749 = vmatpush3.bf16.msra.mxu1 %v781_v2  ;;  %s264_s24 = scalar_lea.vmem %s922_s4, %s645_s26 }
  0x11   : > { %v787_v4 = vld [vmem:[%s875_s29] sm:$0xff]   ;;  %v788_v5 = vld [vmem:[%s875_s29 + $0x10] sm:$0xff]   ;;  %721 = vmatprep.subr.bf16.mxu0 %v782_v3  ;;  %742 = vmatprep.subr.bf16.mxu1 %v782_v3  ;;  %v789_v10 = vld [vmem:[%s875_s29 + $0x8] sm:$0xff]  }
  0x12   : > { %731 = vmatprep.mubr.bf16.mxu0 %v787_v4  ;;  %735 = vmatprep.mubr.bf16.mxu1 %v788_v5  ;;  %v790_v11 = vld [vmem:[%s875_s29 + $0x18] sm:$0xff]  }
  0x14   : > { %722 = vmatpush3.bf16.msra.mxu0 %v782_v3  ;;  %750 = vmatpush3.bf16.msra.mxu1 %v782_v3 }
  0x15   : > { %723 = vmatprep.subr.bf16.mxu0 %v783_v6  ;;  %743 = vmatprep.subr.bf16.mxu1 %v783_v6 }
  0x18   : > { %724 = vmatpush3.bf16.msra.mxu0 %v783_v6  ;;  %751 = vmatpush3.bf16.msra.mxu1 %v783_v6 }
  0x19   : > { %725 = vmatprep.subr.bf16.mxu0 %v784_v7  ;;  %744 = vmatprep.subr.bf16.mxu1 %v784_v7 }
  0x1c   : > { %726 = vmatpush3.bf16.msra.mxu0 %v784_v7  ;;  %752 = vmatpush3.bf16.msra.mxu1 %v784_v7 }
  0x1d   : > { %727 = vmatprep.subr.bf16.mxu0 %v785_v8  ;;  %745 = vmatprep.subr.bf16.mxu1 %v785_v8 }
  0x20   : > { %728 = vmatpush3.bf16.msra.mxu0 %v785_v8  ;;  %753 = vmatpush3.bf16.msra.mxu1 %v785_v8 }
  0x21   : > { %729 = vmatprep.subr.bf16.mxu0 %v786_v9  ;;  %746 = vmatprep.subr.bf16.mxu1 %v786_v9 }
  0x24   : > { %730 = vmatpush3.bf16.msra.mxu0 %v786_v9  ;;  %754 = vmatpush3.bf16.msra.mxu1 %v786_v9 }
  0x27   : > { %732 = vmatmul.mubr.bf16.vlgmr.msra.gmra.mrb[0].mxu0 %v789_v10  ;;  %736 = vmatmul.mubr.bf16.vlgmr.msra.gmra.mrb[0].mxu1 %v790_v11 }
  0xfa   : > { %v733_v13 = vpop.f32.mrb[0].mxu0  ;;  %v737_v15 = vpop.f32.mrb[0].mxu1 }
  0xfb   : > { %v437_v16 = vmul.f32 %v733_v13, %v660_v12  ;;  %v441_v17 = vmul.f32 %v737_v15, %v660_v12  ;;  %v397_v18 = vpop.f32.mrb[1].mxu0  ;;  %v413_v19 = vpop.f32.mrb[1].mxu1 }
  0xfc   : > { %v435_v20 = vmul.f32 %v660_v12, %v397_v18  ;;  %v439_v21 = vmul.f32 %v660_v12, %v413_v19  ;;  %v734_v22 = vpop.f32.mrb[2].mxu0  ;;  %v738_v23 = vpop.f32.mrb[2].mxu1 }
  0xfd   : > { %v452_v24 = vadd.f32 %v661_v14, %v437_v16  ;;  %v456_v25 = vadd.f32 %v661_v14, %v441_v17  ;;  %v438_v26 = vmul.f32 %v734_v22, %v660_v12  ;;  %v442_v27 = vmul.f32 %v738_v23, %v660_v12  ;;  %v400_v28 = vpop.f32.mrb[3].mxu0  ;;  %v416_v29 = vpop.f32.mrb[3].mxu1 }
  0xfe   : > { %v450_v30 = vadd.f32 %v661_v14, %v435_v20  ;;  %v454_v31 = vadd.f32 %v661_v14, %v439_v21  ;;  %v436_v32 = vmul.f32 %v660_v12, %v400_v28  ;;  %v440_v33 = vmul.f32 %v660_v12, %v416_v29 }
  0xff   : > { %vm460_vm0 = vcmp.gt.f32.partialorder %v452_v24, 0.0  ;;  %v468_v34 = vmul.f32 0.1, %v452_v24  ;;  %vm464_vm1 = vcmp.gt.f32.partialorder %v456_v25, 0.0  ;;  %v472_v35 = vmul.f32 0.1, %v456_v25 }
 0x100   : > { %vm458_vm2 = vcmp.gt.f32.partialorder %v450_v30, 0.0  ;;  %v466_v36 = vmul.f32 0.1, %v450_v30  ;;  %vm462_vm3 = vcmp.gt.f32.partialorder %v454_v31, 0.0  ;;  %v470_v37 = vmul.f32 0.1, %v454_v31 }
 0x101   : > { %v453_v38 = vadd.f32 %v661_v14, %v438_v26  ;;  %v457_v39 = vadd.f32 %v661_v14, %v442_v27  ;;  %v476_v40 = vsel %vm460_vm0, %v452_v24, %v468_v34  ;;  %v480_v41 = vsel %vm464_vm1, %v456_v25, %v472_v35 }
 0x102   : > { %v451_v42 = vadd.f32 %v661_v14, %v436_v32  ;;  %v455_v43 = vadd.f32 %v661_v14, %v440_v33  ;;  %v474_v48 = vsel %vm458_vm2, %v450_v30, %v466_v36  ;;  %v478_v49 = vsel %vm462_vm3, %v454_v31, %v470_v37 }
 0x103   : > { %vm461_vm4 = vcmp.gt.f32.partialorder %v453_v38, 0.0  ;;  %v469_v44 = vmul.f32 0.1, %v453_v38  ;;  %vm465_vm5 = vcmp.gt.f32.partialorder %v457_v39, 0.0  ;;  %v473_v45 = vmul.f32 0.1, %v457_v39 }
 0x104   : > { %vm459_vm6 = vcmp.gt.f32.partialorder %v451_v42, 0.0  ;;  %v467_v46 = vmul.f32 0.1, %v451_v42  ;;  %vm463_vm7 = vcmp.gt.f32.partialorder %v455_v43, 0.0  ;;  %v471_v47 = vmul.f32 0.1, %v455_v43 }
 0x105   : > { %v477_v50 = vsel %vm461_vm4, %v453_v38, %v469_v44  ;;  %v481_v51 = vsel %vm465_vm5, %v457_v39, %v473_v45 }
 0x106   : > { %v688_v52 = vpack.c.bf16 %v477_v50, %v476_v40  ;;  %v698_v53 = vpack.c.bf16 %v481_v51, %v480_v41  ;;  %v475_v54 = vsel %vm459_vm6, %v451_v42, %v467_v46  ;;  %v479_v55 = vsel %vm463_vm7, %v455_v43, %v471_v47 }
 0x107   : > { %v683_v56 = vpack.c.bf16 %v475_v54, %v474_v48  ;;  %v693_v57 = vpack.c.bf16 %v479_v55, %v478_v49 }
 0x108   : > { %700 = vst [vmem:[%s264_s24 + $0x8] sm:$0xff] %v688_v52   ;;  %702 = vst [vmem:[%s264_s24 + $0x18] sm:$0xff] %v698_v53  }
 0x109   : > { %684 = vst [vmem:[%s264_s24] sm:$0xff] %v683_v56   ;;  %701 = vst [vmem:[%s264_s24 + $0x10] sm:$0xff] %v693_v57  }
 0x10a PF: > { %s14_s17 = sadd.s32 1, %s813_s17   ;;  %s923_s15 = smov %s809_s16 }
 0x10b   : > { %p11_p5 = scmp.ge.s32.totalorder %s14_s17, 4   ;;  %s924_s16 = smov %s926_s18 }
 0x10d   :  { %13 = sbr.rel (!%p11_p5) target bundleno = 2 (0x2), region = 75 }

// kernel: basic_block_forward.3
= control target key start
LH: loop header
LB: loop body
LE: loop exit
PB: predicated region body
PF: predicated region fallthrough
CT: control target
= control target key end

     0   :  { %s2475_s18 = smov 0   ;;  %s2477_s19 = smov 0   ;;  %s3067_s0 = inlined_call_operand.vmem [shape: bf16[1,2,10,10,128], index: 0, kind: input, shape index: {}]   ;;  %s3068_s1 = inlined_call_operand.vmem [shape: bf16[1280,128], index: 1, kind: input, shape index: {}]   ;;  %s3069_s2 = inlined_call_operand.vmem [shape: f32[1,128], index: 2, kind: input, shape index: {}]   ;;  %s3070_s3 = inlined_call_operand.vmem [shape: f32[1,128], index: 3, kind: input, shape index: {}]   ;;  %s3071_s4 = inlined_call_operand.vmem [shape: bf16[128,128], index: 4, kind: input, shape index: {}]   ;;  %s3072_s5 = inlined_call_operand.vmem [shape: f32[128,128], index: 5, kind: output, shape index: {}]  }
   0x1   :  { %s2479_s20 = smov 0  }
   0x2 LB: > { %s24_s21 = sadd.s32 1, %s2439_s19  ;;  %p1930_p0 = scmp.ge.s32.totalorder %s2443_s20, 1  ;;  %s2443_s20 = sphi %s2479_s20, %s15_s20   ;;  %s2439_s19 = sphi %s2477_s19, %s3075_s19   ;;  %s2435_s18 = sphi %s2475_s18, %s3074_s18  }
   0x3   : > { %p25_p1 = scmp.ge.s32.totalorder %s24_s21, 2  ;;  %p237_p2 = scmp.lt.s32.totalorder %s2443_s20, 3 }
   0x5   : > { %s3077_s21 = smov (%p25_p1, %s24_s21), 0  ;;  %p238_p3 = pnand %p1930_p0, %p237_p2 }
   0x6   : > { %v2325_v0 = vld [vmem:[%s3068_s1 + $0x40] sm:$0xff] (!%p238_p3)   ;;  %v2329_v4 = vld [vmem:[%s3068_s1 + $0x48] sm:$0xff] (!%p238_p3)   ;;  %v2333_v8 = vld [vmem:[%s3068_s1 + $0x50] sm:$0xff] (!%p238_p3)   ;;  %p283_p4 = scmp.lt.s32.totalorder (!%p238_p3), %s2435_s18, 1  ;;  %vm366_vm0 = vcmask (!%p238_p3), 1046528   ;;  %vm427_vm1 = vcmask (!%p238_p3), 1045504  }
   0x7   : > { %241 = sbr.rel (%p238_p3) target bundleno = 337 (0x151), region = 40  ;;  %v2326_v1 = vld [vmem:[%s3068_s1 + $0xc0] sm:$0xff] (!%p238_p3)   ;;  %2084 = vmatprep.subr.bf16.mxu0 (!%p238_p3), %v2325_v0  ;;  %v2330_v5 = vld [vmem:[%s3068_s1 + $0xc8] sm:$0xff] (!%p238_p3)   ;;  %v2334_v9 = vld [vmem:[%s3068_s1 + $0xd0] sm:$0xff] (!%p238_p3)  }
   0x8   : > { %v2327_v2 = vld [vmem:[%s3068_s1] sm:$0xff] (!%p238_p3)   ;;  %2124 = vmatprep.subr.bf16.mxu1 (!%p238_p3), %v2326_v1  ;;  %v2331_v6 = vld [vmem:[%s3068_s1 + $0x8] sm:$0xff] (!%p238_p3)   ;;  %v2335_v10 = vld [vmem:[%s3068_s1 + $0x10] sm:$0xff] (!%p238_p3)  }
   0x9   : > { %v2328_v3 = vld [vmem:[%s3068_s1 + $0x80] sm:$0xff] (!%p238_p3)   ;;  %2085 = vmatpush3.bf16.msra.mxu0 (!%p238_p3), %v2327_v2  ;;  %v2332_v7 = vld [vmem:[%s3068_s1 + $0x88] sm:$0xff] (!%p238_p3)   ;;  %v2336_v11 = vld [vmem:[%s3068_s1 + $0x90] sm:$0xff] (!%p238_p3)  }
   0xa   : > { %2125 = vmatpush3.bf16.msra.mxu1 (!%p238_p3), %v2328_v3  ;;  %2086 = vmatprep.subr.bf16.mxu0 (!%p238_p3), %v2329_v4  ;;  %v2337_v12 = vld [vmem:[%s3068_s1 + $0x58] sm:$0xff] (!%p238_p3)   ;;  %v2341_v16 = vld [vmem:[%s3068_s1 + $0x60] sm:$0xff] (!%p238_p3)   ;;  %v2345_v20 = vld [vmem:[%s3068_s1 + $0x68] sm:$0xff] (!%p238_p3)  }
   0xb   : > { %2126 = vmatprep.subr.bf16.mxu1 (!%p238_p3), %v2330_v5  ;;  %v2338_v13 = vld [vmem:[%s3068_s1 + $0xd8] sm:$0xff] (!%p238_p3)   ;;  %v2342_v17 = vld [vmem:[%s3068_s1 + $0xe0] sm:$0xff] (!%p238_p3)   ;;  %v2346_v21 = vld [vmem:[%s3068_s1 + $0xe8] sm:$0xff] (!%p238_p3)  }
   0xc   : > { %v2339_v14 = vld [vmem:[%s3068_s1 + $0x18] sm:$0xff] (!%p238_p3)   ;;  %v2343_v18 = vld [vmem:[%s3068_s1 + $0x20] sm:$0xff] (!%p238_p3)   ;;  %v2347_v22 = vld [vmem:[%s3068_s1 + $0x28] sm:$0xff] (!%p238_p3)  }
   0xd   : > { %2087 = vmatpush3.bf16.msra.mxu0 (!%p238_p3), %v2331_v6  ;;  %v2340_v15 = vld [vmem:[%s3068_s1 + $0x98] sm:$0xff] (!%p238_p3)   ;;  %v2344_v19 = vld [vmem:[%s3068_s1 + $0xa0] sm:$0xff] (!%p238_p3)   ;;  %v2348_v23 = vld [vmem:[%s3068_s1 + $0xa8] sm:$0xff] (!%p238_p3)  }
   0xe   : > { %2127 = vmatpush3.bf16.msra.mxu1 %v2332_v7  ;;  %2088 = vmatprep.subr.bf16.mxu0 %v2333_v8  ;;  %s284_s24 = scalar_select %p283_p4, %s2435_s18, 1  ;;  %v2349_v24 = vld [vmem:[%s3068_s1 + $0x70] sm:$0xff]   ;;  %v2353_v28 = vld [vmem:[%s3068_s1 + $0x78] sm:$0xff]   ;;  %v2359_v48 = vld [vmem:[%s3068_s1 + $0x140] sm:$0xff]  }
   0xf   : > { %2128 = vmatprep.subr.bf16.mxu1 %v2334_v9  ;;  %v2350_v25 = vld [vmem:[%s3068_s1 + $0xf0] sm:$0xff]   ;;  %v2354_v29 = vld [vmem:[%s3068_s1 + $0xf8] sm:$0xff]   ;;  %v2360_v50 = vld [vmem:[%s3068_s1 + $0x1c0] sm:$0xff]  }
  0x10   : > { %s2300_s8 = smul.u32 80, %s284_s24  ;;  %v2351_v26 = vld [vmem:[%s3068_s1 + $0x30] sm:$0xff]   ;;  %v2355_v30 = vld [vmem:[%s3068_s1 + $0x38] sm:$0xff]   ;;  %v2361_v58 = vld [vmem:[%s3068_s1 + $0x100] sm:$0xff]   ;;  %s1932_s24 = sshll.u32 %s2435_s18, 3 }
  0x11   : > { %2089 = vmatpush3.bf16.msra.mxu0 %v2335_v10  ;;  %v2352_v27 = vld [vmem:[%s3068_s1 + $0xb0] sm:$0xff]   ;;  %v2356_v31 = vld [vmem:[%s3068_s1 + $0xb8] sm:$0xff]   ;;  %v2362_v62 = vld [vmem:[%s3068_s1 + $0x180] sm:$0xff]   ;;  %p2729_p5 = scmp.lt.s32.totalorder %s1932_s24, 15 }
  0x12   : > { %2129 = vmatpush3.bf16.msra.mxu1 %v2336_v11  ;;  %2090 = vmatprep.subr.bf16.mxu0 %v2337_v12  ;;  %s2590_s23 = scalar_lea.vmem %s3067_s0, %s2300_s8  ;;  %v2363_v1 = vld [vmem:[%s3068_s1 + $0x148] sm:$0xff]  }
  0x13   : > { %2130 = vmatprep.subr.bf16.mxu1 %v2338_v13  ;;  %v314_v32 = vld [vmem:[%s2590_s23] sm:$0xf]  ;;  %v315_v33 = vld [vmem:[%s2590_s23 + $0x8] sm:$0xf]  ;;  %v334_v34 = vld [vmem:[%s2590_s23 + $0x4] sm:$0x1] }
  0x14   : > { %v322_v35 = vunpack.c.l.bf16 %v314_v32  ;;  %v323_v36 = vunpack.c.l.bf16 %v315_v33  ;;  %v335_v37 = vld [vmem:[%s2590_s23 + $0xc] sm:$0x1]  ;;  %v342_v38 = vunpack.c.l.bf16 %v334_v34  ;;  %v2603_v39 = vld [vmem:[%s2590_s23 + $0x8] sm:$0xf]  ;;  %v2606_v40 = vld [vmem:[%s2590_s23 + $0x10] sm:$0xf]  ;;  %v1936_v55 = vcombine.low %v314_v32, %v315_v33 }
  0x15   : > { %2091 = vmatpush3.bf16.msra.mxu0 %v2339_v14  ;;  %v343_v41 = vunpack.c.l.bf16 %v335_v37  ;;  %v1948_v42 = vcombine.low %v2603_v39, %v2606_v40  ;;  %v403_v43 = vld [vmem:[%s2590_s23] sm:$0xe]  ;;  %v404_v47 = vld [vmem:[%s2590_s23 + $0x8] sm:$0xe]  ;;  %v316_v6 = vld [vmem:[%s2590_s23 + $0x10] sm:$0xf] }
  0x16   : > { %2131 = vmatpush3.bf16.msra.mxu1 %v2340_v15  ;;  %2092 = vmatprep.subr.bf16.mxu0 %v2341_v16  ;;  %v367_v44 = vrot.slane %v322_v35, 1  ;;  %v368_v45 = vrot.slane %v342_v38, 1  ;;  %v370_v46 = vrot.slane %v323_v36, 1  ;;  %v411_v52 = vunpack.c.l.bf16 %v403_v43  ;;  %v2364_v3 = vld [vmem:[%s3068_s1 + $0x1c8] sm:$0xff]   ;;  %v317_v7 = vld [vmem:[%s2590_s23 + $0x18] sm:$0xf] }
  0x17   : > { %2132 = vmatprep.subr.bf16.mxu1 %v2342_v17  ;;  %v371_v49 = vrot.slane %v343_v41, 1  ;;  %1531 = vmatprep.mubr.bf16.mxu1 %v1948_v42  ;;  %v412_v53 = vunpack.c.l.bf16 %v404_v47  ;;  %v429_v56 = vrot.slane %v342_v38, 2  ;;  %v432_v57 = vrot.slane %v343_v41, 2  ;;  %v2365_v4 = vld [vmem:[%s3068_s1 + $0x108] sm:$0xff]   ;;  %v336_v9 = vld [vmem:[%s2590_s23 + $0x14] sm:$0x1] }
  0x18   : > { %v369_v51 = vsel %vm366_vm0, %v367_v44, %v368_v45  ;;  %v428_v60 = vrot.slane %v411_v52, 2  ;;  %v2366_v5 = vld [vmem:[%s3068_s1 + $0x188] sm:$0xff]   ;;  %v324_v8 = vunpack.c.l.bf16 %v316_v6  ;;  %v337_v10 = vld [vmem:[%s2590_s23 + $0x1c] sm:$0x1]  ;;  %v325_v11 = vunpack.c.l.bf16 %v317_v7  ;;  %v2645_v14 = vld [vmem:[%s2590_s23 + $0x18] sm:$0xf] }
  0x19   : > { %2093 = vmatpush3.bf16.msra.mxu0 %v2343_v18  ;;  %v372_v54 = vsel %vm366_vm0, %v370_v46, %v371_v49  ;;  %v431_v61 = vrot.slane %v412_v53, 2  ;;  %v344_v12 = vunpack.c.l.bf16 %v336_v9  ;;  %v345_v13 = vunpack.c.l.bf16 %v337_v10  ;;  %v2648_v15 = vld [vmem:[%s2590_s23 + $0x20] sm:$0xf]  ;;  %v405_v16 = vld [vmem:[%s2590_s23 + $0x10] sm:$0xe]  ;;  %v2373_v41 = vld [vmem:[%s3068_s1 + $0x158] sm:$0xff]  }
  0x1a   : > { %2133 = vmatpush3.bf16.msra.mxu1 %v2344_v19  ;;  %2094 = vmatprep.subr.bf16.mxu0 %v2345_v20  ;;  %v399_v59 = vpack.c.bf16 %v372_v54, %v369_v51  ;;  %v430_v63 = vsel %vm427_vm1, %v428_v60, %v429_v56  ;;  %v373_v17 = vrot.slane %v324_v8, 1  ;;  %v1949_v18 = vcombine.low %v2645_v14, %v2648_v15  ;;  %v406_v19 = vld [vmem:[%s2590_s23 + $0x18] sm:$0xe]  ;;  %v2369_v20 = vld [vmem:[%s3068_s1 + $0x150] sm:$0xff]   ;;  %v318_v46 = vld [vmem:[%s2590_s23 + $0x20] sm:$0xf] }
  0x1b   : > { %2134 = vmatprep.subr.bf16.mxu1 %v2346_v21  ;;  %v433_v0 = vsel %vm427_vm1, %v431_v61, %v432_v57  ;;  %v374_v21 = vrot.slane %v344_v12, 1  ;;  %v438_v33 = vrot.slane %v345_v13, 2  ;;  %v2372_v36 = vld [vmem:[%s3068_s1 + $0x190] sm:$0xff]   ;;  %v2374_v43 = vld [vmem:[%s3068_s1 + $0x1d8] sm:$0xff]   ;;  %v319_v47 = vld [vmem:[%s2590_s23 + $0x28] sm:$0xf]  ;;  %v474_v10 = vunpack.c.l.bf16 %v2606_v40 }
  0x1c   : > { %1466 = vmatprep.mubr.bf16.mxu0 %v399_v59  ;;  %v460_v2 = vpack.c.bf16 %v433_v0, %v430_v63  ;;  %v2375_v44 = vld [vmem:[%s3068_s1 + $0x118] sm:$0xff]   ;;  %v327_v49 = vunpack.c.l.bf16 %v319_v47  ;;  %v339_v51 = vld [vmem:[%s2590_s23 + $0x2c] sm:$0x1]  ;;  %v2687_v52 = vld [vmem:[%s2590_s23 + $0x28] sm:$0xf]  ;;  %v1938_v8 = vcombine.low %v318_v46, %v319_v47  ;;  %s3079_s24 = smov (!%p2729_p5, %s1932_s24), 15 }
  0x1d   : > { %2095 = vmatpush3.bf16.msra.mxu0 %v2347_v22  ;;  %v376_v22 = vrot.slane %v325_v11, 1  ;;  %v2376_v45 = vld [vmem:[%s3068_s1 + $0x198] sm:$0xff]   ;;  %v347_v54 = vunpack.c.l.bf16 %v339_v51  ;;  %v407_v56 = vld [vmem:[%s2590_s23 + $0x20] sm:$0xe]  ;;  %v408_v57 = vld [vmem:[%s2590_s23 + $0x28] sm:$0xe] }
  0x1e   : > { %2135 = vmatpush3.bf16.msra.mxu1 %v2348_v23  ;;  %2096 = vmatprep.subr.bf16.mxu0 %v2349_v24  ;;  %v377_v23 = vrot.slane %v345_v13, 1  ;;  %v413_v24 = vunpack.c.l.bf16 %v405_v16  ;;  %v382_v59 = vrot.slane %v327_v49, 1  ;;  %v415_v63 = vunpack.c.l.bf16 %v407_v56  ;;  %v2379_v0 = vld [vmem:[%s3068_s1 + $0x160] sm:$0xff]   ;;  %v2711_v11 = vld [vmem:[%s2590_s23 + $0xc] sm:$0x1]  ;;  %v2389_v47 = vld [vmem:[%s3068_s1 + $0x170] sm:$0xff]  }
  0x1f   : > { %2136 = vmatprep.subr.bf16.mxu1 %v2350_v25  ;;  %v2370_v25 = vld [vmem:[%s3068_s1 + $0x1d0] sm:$0xff]   ;;  %s1933_s9 = sshll.u32 %s3079_s24, 2  ;;  %s1935_s7 = sshll.u32 %s3079_s24, 3 }
  0x20   : > { %v434_v32 = vrot.slane %v413_v24, 2  ;;  %v440_v9 = vrot.slane %v415_v63, 2  ;;  %v2738_v24 = vrot.slane %v474_v10, 1  ;;  %v477_v10 = vunpack.c.l.bf16 %v2687_v52  ;;  %s2975_s26 = scalar_lea.vmem %s3071_s4, %s1933_s9  ;;  %s3046_s13 = scalar_lea.vmem %s3072_s5, %s1935_s7 }
  0x21   : > { %2097 = vmatpush3.bf16.msra.mxu0 %v2351_v26  ;;  %v1937_v26 = vcombine.low %v316_v6, %v317_v7 }
  0x22   : > { %2137 = vmatpush3.bf16.msra.mxu1 %v2352_v27  ;;  %2098 = vmatprep.subr.bf16.mxu0 %v2353_v28  ;;  %v414_v27 = vunpack.c.l.bf16 %v406_v19  ;;  %v435_v28 = vrot.slane %v344_v12, 2  ;;  %v2714_v12 = vld [vmem:[%s2590_s23 + $0x14] sm:$0x1]  ;;  %v2383_v19 = vld [vmem:[%s3068_s1 + $0x168] sm:$0xff]  }
  0x23   : > { %2138 = vmatprep.subr.bf16.mxu1 %v2354_v29  ;;  %v2371_v29 = vld [vmem:[%s3068_s1 + $0x110] sm:$0xff]  }
  0x24   : > { %v437_v35 = vrot.slane %v414_v27, 2  ;;  %v436_v37 = vsel %vm427_vm1, %v434_v32, %v435_v28  ;;  %v494_v27 = vunpack.c.l.bf16 %v2714_v12  ;;  %v320_v28 = vld [vmem:[%s2590_s23 + $0x30] sm:$0xf]  ;;  %v1960_v12 = vld [vmem:[%s2590_s23 + $0x8] sm:$0xe] }
  0x25   : > { %2099 = vmatpush3.bf16.msra.mxu0 %v2355_v30  ;;  %v375_v30 = vsel %vm366_vm0, %v373_v17, %v374_v21  ;;  %v2382_v17 = vld [vmem:[%s3068_s1 + $0x1a0] sm:$0xff]  }
  0x26   : > { %2139 = vmatpush3.bf16.msra.mxu1 %v2356_v31  ;;  %2164 = vmatprep.subr.bf16.mxu0 %v2359_v48  ;;  %v378_v31 = vsel %vm366_vm0, %v376_v22, %v377_v23  ;;  %v439_v38 = vsel %vm427_vm1, %v437_v35, %v438_v33  ;;  %v326_v48 = vunpack.c.l.bf16 %v318_v46  ;;  %v2385_v23 = vld [vmem:[%s3068_s1 + $0x128] sm:$0xff]   ;;  %v341_v33 = vld [vmem:[%s2590_s23 + $0x3c] sm:$0x1]  ;;  %v2750_v35 = vld [vmem:[%s2590_s23 + $0x38] sm:$0xf]  ;;  %v521_v49 = vrot.slane %v494_v27, 1 }
  0x27   : > { %2204 = vmatprep.subr.bf16.mxu1 %v2360_v50  ;;  %v400_v34 = vpack.c.bf16 %v378_v31, %v375_v30  ;;  %v461_v42 = vpack.c.bf16 %v439_v38, %v436_v37  ;;  %v338_v50 = vld [vmem:[%s2590_s23 + $0x24] sm:$0x1]  ;;  %v340_v30 = vld [vmem:[%s2590_s23 + $0x34] sm:$0x1]  ;;  %v328_v31 = vunpack.c.l.bf16 %v320_v28  ;;  %v349_v37 = vunpack.c.l.bf16 %v341_v33 }
  0x28   : > { %1467 = vmatmul.mubr.bf16.vlgmr.msra.gmra.mrb[0].mxu0 %v1936_v55  ;;  %v346_v53 = vunpack.c.l.bf16 %v338_v50  ;;  %v2690_v55 = vld [vmem:[%s2590_s23 + $0x30] sm:$0xf] }
  0x29   : > { %2165 = vmatpush3.bf16.msra.mxu0 %v2361_v58  ;;  %1532 = vmatmul.mubr.bf16.vlgmr.msra.gmra.mrb[0].mxu1 %v460_v2  ;;  %v379_v58 = vrot.slane %v326_v48, 1  ;;  %v1950_v60 = vcombine.low %v2687_v52, %v2690_v55  ;;  %v416_v2 = vunpack.c.l.bf16 %v408_v57  ;;  %v389_v50 = vrot.slane %v349_v37, 1 }
  0x2a   : > { %2166 = vmatprep.subr.bf16.mxu0 %v2363_v1  ;;  %2205 = vmatpush3.bf16.msra.mxu1 %v2362_v62  ;;  %v380_v61 = vrot.slane %v346_v53, 1  ;;  %v383_v62 = vrot.slane %v347_v54, 1  ;;  %v473_v1 = vunpack.c.l.bf16 %v2603_v39  ;;  %v2381_v39 = vld [vmem:[%s3068_s1 + $0x120] sm:$0xff]   ;;  %v479_v52 = vunpack.c.l.bf16 %v2750_v35 }
  0x2b   : > { %2206 = vmatprep.subr.bf16.mxu1 %v2364_v3  ;;  %1539 = vmatprep.mubr.bf16.mxu1 %v1949_v18  ;;  %v441_v3 = vrot.slane %v346_v53, 2  ;;  %v443_v16 = vrot.slane %v416_v2, 2  ;;  %v2390_v53 = vld [vmem:[%s3068_s1 + $0x1f0] sm:$0xff]  }
  0x2c   : > { %1474 = vmatprep.mubr.bf16.mxu0 %v400_v34  ;;  %v381_v6 = vsel %vm366_vm0, %v379_v58, %v380_v61  ;;  %v384_v7 = vsel %vm366_vm0, %v382_v59, %v383_v62  ;;  %v2733_v21 = vrot.slane %v473_v1, 1  ;;  %v348_v34 = vunpack.c.l.bf16 %v340_v30  ;;  %v2391_v59 = vld [vmem:[%s3068_s1 + $0x130] sm:$0xff]  }
  0x2d   : > { %2167 = vmatpush3.bf16.msra.mxu0 %v2365_v4  ;;  %v444_v4 = vrot.slane %v347_v54, 2  ;;  %v401_v13 = vpack.c.bf16 %v384_v7, %v381_v6  ;;  %v442_v18 = vsel %vm427_vm1, %v440_v9, %v441_v3  ;;  %v450_v58 = vrot.slane %v349_v37, 2  ;;  %v2395_v9 = vld [vmem:[%s3068_s1 + $0x138] sm:$0xff]  }
  0x2e   : > { %2207 = vmatpush3.bf16.msra.mxu1 %v2366_v5  ;;  %2168 = vmatprep.subr.bf16.mxu0 %v2369_v20  ;;  %v2380_v5 = vld [vmem:[%s3068_s1 + $0x1e0] sm:$0xff]   ;;  %v2384_v20 = vld [vmem:[%s3068_s1 + $0x1e8] sm:$0xff]   ;;  %v447_v57 = vrot.slane %v348_v34, 2  ;;  %v476_v1 = vunpack.c.l.bf16 %v2648_v15  ;;  %v2394_v15 = vld [vmem:[%s3068_s1 + $0x1f8] sm:$0xff]   ;;  %v581_v7 = vrot.slane %v494_v27, 2  ;;  %v2815_v30 = vrot.slane %v477_v10, 1 }
  0x2f   : > { %2208 = vmatprep.subr.bf16.mxu1 %v2370_v25  ;;  %v445_v40 = vsel %vm427_vm1, %v443_v16, %v444_v4  ;;  %v2386_v25 = vld [vmem:[%s3068_s1 + $0x1a8] sm:$0xff]   ;;  %v478_v16 = vunpack.c.l.bf16 %v2690_v55 }
  0x30   : > { %1475 = vmatmul.mubr.bf16.gmra.mrb[4].mxu0 %v1937_v26  ;;  %v462_v22 = vpack.c.bf16 %v445_v40, %v442_v18  ;;  %v493_v26 = vunpack.c.l.bf16 %v2711_v11  ;;  %v2396_v11 = vld [vmem:[%s3068_s1 + $0x1b8] sm:$0xff]   ;;  %v561_v18 = vunpack.c.l.bf16 %v1960_v12 }
  0x31   : > { %2169 = vmatpush3.bf16.msra.mxu0 %v2371_v29  ;;  %1540 = vmatmul.mubr.bf16.gmra.mrb[4].mxu1 %v461_v42  ;;  %v321_v29 = vld [vmem:[%s2590_s23 + $0x38] sm:$0xf] }
  0x32   : > { %2209 = vmatpush3.bf16.msra.mxu1 %v2372_v36  ;;  %2170 = vmatprep.subr.bf16.mxu0 %v2373_v41  ;;  %v329_v32 = vunpack.c.l.bf16 %v321_v29  ;;  %v2753_v36 = vld [vmem:[%s2590_s23 + $0x40] sm:$0xf]  ;;  %v409_v41 = vld [vmem:[%s2590_s23 + $0x30] sm:$0xe]  ;;  %v410_v42 = vld [vmem:[%s2590_s23 + $0x38] sm:$0xe]  ;;  %v1939_v62 = vcombine.low %v320_v28, %v321_v29 }
  0x33   : > { %2210 = vmatprep.subr.bf16.mxu1 %v2374_v43  ;;  %1547 = vmatprep.mubr.bf16.mxu1 %v1950_v60  ;;  %v1951_v38 = vcombine.low %v2750_v35, %v2753_v36  ;;  %v385_v43 = vrot.slane %v328_v31, 1  ;;  %v417_v46 = vunpack.c.l.bf16 %v409_v41  ;;  %v518_v48 = vrot.slane %v493_v26, 1  ;;  %v1969_v40 = vld [vmem:[%s2590_s23 + $0x18] sm:$0xf]  ;;  %v2398_v29 = vld [vmem:[%s3068_s1 + $0x240] sm:$0xff]  }
  0x34   : > { %1482 = vmatprep.mubr.bf16.mxu0 %v401_v13  ;;  %v418_v51 = vunpack.c.l.bf16 %v410_v42  ;;  %v475_v60 = vunpack.c.l.bf16 %v2645_v14  ;;  %v2393_v14 = vld [vmem:[%s3068_s1 + $0x178] sm:$0xff]   ;;  %v577_v27 = vrot.slane %v561_v18, 2  ;;  %v2827_v42 = vrot.slane %v479_v52, 1  ;;  %v2403_v18 = vld [vmem:[%s3068_s1 + $0x250] sm:$0xff]  }
  0x35   : > { %2171 = vmatpush3.bf16.msra.mxu0 %v2375_v44  ;;  %v386_v44 = vrot.slane %v348_v34, 1  ;;  %v446_v56 = vrot.slane %v417_v46, 2  ;;  %v519_v13 = vsel %vm366_vm0, %v2733_v21, %v518_v48  ;;  %v522_v21 = vsel %vm366_vm0, %v2738_v24, %v521_v49  ;;  %v1954_v49 = vld [vmem:[%s2590_s23 + $0x1c] sm:$0x1] }
  0x36   : > { %2211 = vmatpush3.bf16.msra.mxu1 %v2376_v45  ;;  %2172 = vmatprep.subr.bf16.mxu0 %v2379_v0  ;;  %v388_v45 = vrot.slane %v329_v32, 1  ;;  %v449_v63 = vrot.slane %v418_v51, 2  ;;  %v2392_v0 = vld [vmem:[%s3068_s1 + $0x1b0] sm:$0xff]   ;;  %v2817_v34 = vrot.slane %v478_v16, 1  ;;  %v549_v41 = vpack.c.bf16 %v522_v21, %v519_v13 }
  0x37   : > { %2212 = vmatprep.subr.bf16.mxu1 %v2380_v5  ;;  %v387_v54 = vsel %vm366_vm0, %v385_v43, %v386_v44  ;;  %v448_v3 = vsel %vm427_vm1, %v446_v56, %v447_v57  ;;  %v578_v5 = vrot.slane %v493_v26, 2  ;;  %v2806_v26 = vld [vmem:[%s2590_s23 + $0x1c] sm:$0x1]  ;;  %v2400_v44 = vld [vmem:[%s3068_s1 + $0x248] sm:$0xff]   ;;  %v1962_v56 = vld [vmem:[%s2590_s23 + $0x18] sm:$0xe] }
  0x38   : > { %1483 = vmatmul.mubr.bf16.gmra.mrb[8].mxu0 %v1938_v8  ;;  %v390_v61 = vsel %vm366_vm0, %v388_v45, %v389_v50  ;;  %v451_v4 = vsel %vm427_vm1, %v449_v63, %v450_v58  ;;  %v2783_v8 = vrot.slane %v475_v60, 1  ;;  %v643_v28 = vunpack.c.l.bf16 %v2806_v26  ;;  %v1955_v50 = vld [vmem:[%s2590_s23 + $0x24] sm:$0x1]  ;;  %v1963_v57 = vld [vmem:[%s2590_s23 + $0x20] sm:$0xe] }
  0x39   : > { %2173 = vmatpush3.bf16.msra.mxu0 %v2381_v39  ;;  %1548 = vmatmul.mubr.bf16.gmra.mrb[8].mxu1 %v462_v22  ;;  %v402_v2 = vpack.c.bf16 %v390_v61, %v387_v54  ;;  %v463_v6 = vpack.c.bf16 %v451_v4, %v448_v3  ;;  %v2788_v39 = vrot.slane %v476_v1, 1  ;;  %v579_v24 = vsel %vm427_vm1, %v577_v27, %v578_v5  ;;  %v2840_v58 = vld [vmem:[%s2590_s23 + $0x20] sm:$0xf]  ;;  %v2851_v1 = vld [vmem:[%s2590_s23 + $0x2c] sm:$0x1]  ;;  %v2405_v27 = vld [vmem:[%s3068_s1 + $0x258] sm:$0xff]  }
  0x3a   : > { %2213 = vmatpush3.bf16.msra.mxu1 %v2382_v17  ;;  %2174 = vmatprep.subr.bf16.mxu0 %v2383_v19  ;;  %v1961_v17 = vld [vmem:[%s2590_s23 + $0x10] sm:$0xe]  ;;  %v670_v37 = vrot.slane %v643_v28, 1  ;;  %v496_v54 = vunpack.c.l.bf16 %v1955_v50  ;;  %v563_v60 = vunpack.c.l.bf16 %v1962_v56  ;;  %v564_v61 = vunpack.c.l.bf16 %v1963_v57 }
  0x3b   : > { %2214 = vmatprep.subr.bf16.mxu1 %v2384_v20  ;;  %1555 = vmatprep.mubr.bf16.mxu1 %v1951_v38  ;;  %v1968_v19 = vld [vmem:[%s2590_s23 + $0x10] sm:$0xf]  ;;  %v562_v20 = vunpack.c.l.bf16 %v1961_v17  ;;  %v2399_v38 = vld [vmem:[%s3068_s1 + $0x200] sm:$0xff]   ;;  %v624_v63 = vunpack.c.l.bf16 %v2840_v58 }
  0x3c   : > { %1490 = vmatprep.mubr.bf16.mxu0 %v402_v2  ;;  %v622_v22 = vunpack.c.l.bf16 %v1968_v19  ;;  %v1976_v48 = vcombine.low %v1968_v19, %v1969_v40  ;;  %v587_v3 = vrot.slane %v496_v54, 2  ;;  %v583_v5 = vrot.slane %v563_v60, 2 }
  0x3d   : > { %2175 = vmatpush3.bf16.msra.mxu0 %v2385_v23  ;;  %v623_v23 = vunpack.c.l.bf16 %v1969_v40  ;;  %v580_v31 = vrot.slane %v562_v20, 2  ;;  %v527_v12 = vrot.slane %v496_v54, 1 }
  0x3e   : > { %2215 = vmatpush3.bf16.msra.mxu1 %v2386_v25  ;;  %2176 = vmatprep.subr.bf16.mxu0 %v2389_v47  ;;  %v2803_v25 = vld [vmem:[%s2590_s23 + $0x14] sm:$0x1]  ;;  %v666_v32 = vrot.slane %v622_v22, 1 }
  0x3f   : > { %2216 = vmatprep.subr.bf16.mxu1 %v2390_v53  ;;  %v642_v55 = vunpack.c.l.bf16 %v2803_v25  ;;  %v669_v33 = vrot.slane %v623_v23, 1  ;;  %v582_v43 = vsel %vm427_vm1, %v580_v31, %v581_v7  ;;  %v495_v53 = vunpack.c.l.bf16 %v1954_v49  ;;  %v2404_v22 = vld [vmem:[%s3068_s1 + $0x210] sm:$0xff]  }
  0x40   : > { %1491 = vmatmul.mubr.bf16.gmra.mrb[12].mxu0 %v1939_v62  ;;  %v609_v45 = vpack.c.bf16 %v582_v43, %v579_v24  ;;  %v2844_v62 = vld [vmem:[%s2590_s23 + $0x28] sm:$0xf]  ;;  %v672_v7 = vrot.slane %v624_v63, 1  ;;  %v528_v20 = vsel %vm366_vm0, %v2788_v39, %v527_v12  ;;  %v1957_v31 = vld [vmem:[%s2590_s23 + $0x34] sm:$0x1]  ;;  %v2921_v63 = vrot.slane %v643_v28, 2 }
  0x41   : > { %2177 = vmatpush3.bf16.msra.mxu0 %v2391_v59  ;;  %1556 = vmatmul.mubr.bf16.gmra.mrb[12].mxu1 %v463_v6  ;;  %v667_v35 = vrot.slane %v642_v55, 1  ;;  %v671_v47 = vsel %vm366_vm0, %v669_v33, %v670_v37  ;;  %v480_v59 = vunpack.c.l.bf16 %v2753_v36  ;;  %v584_v2 = vrot.slane %v495_v53, 2  ;;  %v2401_v36 = vld [vmem:[%s3068_s1 + $0x208] sm:$0xff]   ;;  %v1965_v37 = vld [vmem:[%s2590_s23 + $0x30] sm:$0xe] }
  0x42   : > { %2217 = vmatpush3.bf16.msra.mxu1 %v2392_v0  ;;  %2178 = vmatprep.subr.bf16.mxu0 %v2393_v14  ;;  %v2848_v0 = vld [vmem:[%s2590_s23 + $0x24] sm:$0x1]  ;;  %v625_v4 = vunpack.c.l.bf16 %v2844_v62  ;;  %v586_v6 = vrot.slane %v564_v61, 2  ;;  %v1977_v39 = vcombine.low %v2840_v58, %v2844_v62  ;;  %v498_v24 = vunpack.c.l.bf16 %v1957_v31 }
  0x43   : > { %2218 = vmatprep.subr.bf16.mxu1 %v2394_v15  ;;  %v668_v46 = vsel %vm366_vm0, %v666_v32, %v667_v35  ;;  %1596 = vmatprep.mubr.bf16.mxu0 %v609_v45  ;;  %v644_v14 = vunpack.c.l.bf16 %v2848_v0  ;;  %v645_v15 = vunpack.c.l.bf16 %v2851_v1  ;;  %v585_v13 = vsel %vm427_vm1, %v583_v5, %v584_v2  ;;  %v1964_v35 = vld [vmem:[%s2590_s23 + $0x28] sm:$0xe]  ;;  %v2409_v5 = vld [vmem:[%s3068_s1 + $0x220] sm:$0xff]  }
  0x44   : > { %v698_v51 = vpack.c.bf16 %v671_v47, %v668_v46  ;;  %v675_v10 = vrot.slane %v625_v4, 1  ;;  %v588_v16 = vsel %vm427_vm1, %v586_v6, %v587_v3  ;;  %v2882_v23 = vrot.slane %v480_v59, 1  ;;  %v2902_v46 = vld [vmem:[%s2590_s23 + $0x34] sm:$0x1]  ;;  %v2905_v47 = vld [vmem:[%s2590_s23 + $0x3c] sm:$0x1] }
  0x45   : > { %2179 = vmatpush3.bf16.msra.mxu0 %v2395_v9  ;;  %v673_v9 = vrot.slane %v644_v14, 1  ;;  %v676_v17 = vrot.slane %v645_v15, 1  ;;  %v610_v19 = vpack.c.bf16 %v588_v16, %v585_v13  ;;  %v566_v43 = vunpack.c.l.bf16 %v1965_v37  ;;  %v2408_v3 = vld [vmem:[%s3068_s1 + $0x260] sm:$0xff]  }
  0x46   : > { %2219 = vmatpush3.bf16.msra.mxu1 %v2396_v11  ;;  %2244 = vmatprep.subr.bf16.mxu0 %v2398_v29  ;;  %v524_v11 = vrot.slane %v495_v53, 1  ;;  %v593_v49 = vrot.slane %v498_v24, 2  ;;  %v2406_v53 = vld [vmem:[%s3068_s1 + $0x218] sm:$0xff]   ;;  %v647_v57 = vunpack.c.l.bf16 %v2905_v47  ;;  %v2915_v59 = vrot.slane %v642_v55, 2 }
  0x47   : > { %2284 = vmatprep.subr.bf16.mxu1 %v2398_v29  ;;  %1661 = vmatprep.mubr.bf16.mxu1 %v698_v51  ;;  %v674_v40 = vsel %vm366_vm0, %v672_v7, %v673_v9  ;;  %v677_v21 = vsel %vm366_vm0, %v675_v10, %v676_v17  ;;  %v1956_v29 = vld [vmem:[%s2590_s23 + $0x2c] sm:$0x1]  ;;  %v646_v51 = vunpack.c.l.bf16 %v2902_v46  ;;  %v592_v56 = vrot.slane %v566_v43, 2  ;;  %v1958_v10 = vld [vmem:[%s2590_s23 + $0x3c] sm:$0x1] }
  0x48   : > { %1597 = vmatmul.mubr.bf16.vlgmr.msra.gmra.mrb[16].mxu0 %v549_v41  ;;  %v525_v52 = vsel %vm366_vm0, %v2783_v8, %v524_v11  ;;  %v699_v32 = vpack.c.bf16 %v677_v21, %v674_v40  ;;  %v497_v33 = vunpack.c.l.bf16 %v1956_v29  ;;  %v565_v41 = vunpack.c.l.bf16 %v1964_v35  ;;  %v2410_v9 = vld [vmem:[%s3068_s1 + $0x268] sm:$0xff]   ;;  %v1966_v17 = vld [vmem:[%s2590_s23 + $0x38] sm:$0xe]  ;;  %v1992_v46 = vld [vmem:[%s2590_s23 + $0x30] sm:$0xe] }
  0x49   : > { %1662 = vmatmul.mubr.bf16.vlgmr.msra.gmra.mrb[16].mxu1 %v1976_v48  ;;  %2245 = vmatpush3.bf16.msra.mxu0 %v2399_v38  ;;  %v550_v8 = vpack.c.bf16 %v528_v20, %v525_v52  ;;  %v679_v60 = vrot.slane %v646_v51, 1  ;;  %v594_v25 = vsel %vm427_vm1, %v592_v56, %v593_v49  ;;  %v682_v55 = vrot.slane %v647_v57, 1  ;;  %v2416_v47 = vld [vmem:[%s3068_s1 + $0x238] sm:$0xff]  }
  0x4a   : > { %2292 = vmatpush3.bf16.msra.mxu1 %v2399_v38  ;;  %2246 = vmatprep.subr.bf16.mxu0 %v2400_v44  ;;  %v2895_v38 = vld [vmem:[%s2590_s23 + $0x30] sm:$0xf]  ;;  %v590_v48 = vrot.slane %v497_v33, 2  ;;  %v589_v54 = vrot.slane %v565_v41, 2  ;;  %v530_v62 = vrot.slane %v497_v33, 1  ;;  %v499_v13 = vunpack.c.l.bf16 %v1958_v10 }
  0x4b   : > { %2285 = vmatprep.subr.bf16.mxu1 %v2400_v44  ;;  %1604 = vmatprep.mubr.bf16.mxu0 %v610_v19  ;;  %v2898_v44 = vld [vmem:[%s2590_s23 + $0x38] sm:$0xf]  ;;  %v626_v45 = vunpack.c.l.bf16 %v2895_v38  ;;  %v2950_v19 = vld [vmem:[%s2590_s23 + $0x40] sm:$0xf]  ;;  %v567_v52 = vunpack.c.l.bf16 %v1966_v17 }
  0x4c   : > { %1669 = vmatprep.mubr.bf16.mxu1 %v699_v32  ;;  %v627_v50 = vunpack.c.l.bf16 %v2898_v44  ;;  %v591_v2 = vsel %vm427_vm1, %v589_v54, %v590_v48  ;;  %v531_v28 = vsel %vm366_vm0, %v2815_v30, %v530_v62  ;;  %v1978_v7 = vcombine.low %v2895_v38, %v2898_v44  ;;  %v1959_v30 = vld [vmem:[%s2590_s23 + $0x44] sm:$0x1]  ;;  %v2411_v32 = vld [vmem:[%s3068_s1 + $0x228] sm:$0xff]  }
  0x4d   : > { %2247 = vmatpush3.bf16.msra.mxu0 %v2401_v36  ;;  %v678_v58 = vrot.slane %v626_v45, 1  ;;  %v611_v4 = vpack.c.bf16 %v594_v25, %v591_v2  ;;  %v500_v16 = vunpack.c.l.bf16 %v1959_v30  ;;  %v628_v21 = vunpack.c.l.bf16 %v2950_v19  ;;  %v2415_v25 = vld [vmem:[%s3068_s1 + $0x278] sm:$0xff]  }
  0x4e   : > { %2293 = vmatpush3.bf16.msra.mxu1 %v2401_v36  ;;  %2248 = vmatprep.subr.bf16.mxu0 %v2403_v18  ;;  %v681_v61 = vrot.slane %v627_v50, 1  ;;  %v533_v36 = vrot.slane %v498_v24, 1  ;;  %v595_v33 = vrot.slane %v567_v52, 2  ;;  %v536_v43 = vrot.slane %v499_v13, 1  ;;  %v2413_v50 = vld [vmem:[%s3068_s1 + $0x270] sm:$0xff]  }
  0x4f   : > { %2286 = vmatprep.subr.bf16.mxu1 %v2403_v18  ;;  %v680_v26 = vsel %vm366_vm0, %v678_v58, %v679_v60  ;;  %v1967_v18 = vld [vmem:[%s2590_s23 + $0x40] sm:$0xe]  ;;  %v684_v37 = vrot.slane %v628_v21, 1  ;;  %v539_v44 = vrot.slane %v500_v16, 1  ;;  %v2414_v60 = vld [vmem:[%s3068_s1 + $0x230] sm:$0xff]  }
  0x50   : > { %1605 = vmatmul.mubr.bf16.gmra.mrb[20].mxu0 %v550_v8  ;;  %v683_v6 = vsel %vm366_vm0, %v681_v61, %v682_v55  ;;  %v534_v12 = vsel %vm366_vm0, %v2817_v34, %v533_v36  ;;  %v568_v20 = vunpack.c.l.bf16 %v1967_v18  ;;  %v2955_v8 = vld [vmem:[%s2590_s23 + $0x44] sm:$0x1]  ;;  %v596_v34 = vrot.slane %v499_v13, 2  ;;  %v1989_v36 = vld [vmem:[%s2590_s23 + $0x18] sm:$0xe] }
  0x51   : > { %1670 = vmatmul.mubr.bf16.gmra.mrb[20].mxu1 %v1977_v39  ;;  %2249 = vmatpush3.bf16.msra.mxu0 %v2404_v22  ;;  %v700_v11 = vpack.c.bf16 %v683_v6, %v680_v26  ;;  %v551_v40 = vpack.c.bf16 %v534_v12, %v531_v28  ;;  %v2958_v39 = vld [vmem:[%s2590_s23 + $0x4c] sm:$0x1]  ;;  %v648_v31 = vunpack.c.l.bf16 %v2955_v8  ;;  %v537_v56 = vsel %vm366_vm0, %v2827_v42, %v536_v43  ;;  %v2418_v26 = vld [vmem:[%s2975_s26 + $0x10] sm:$0xff]   ;;  %v1990_v13 = vld [vmem:[%s2590_s23 + $0x20] sm:$0xe] }
  0x52   : > { %2294 = vmatpush3.bf16.msra.mxu1 %v2404_v22  ;;  %2250 = vmatprep.subr.bf16.mxu0 %v2405_v27  ;;  %v1975_v22 = vld [vmem:[%s2590_s23 + $0x48] sm:$0xf]  ;;  %v598_v24 = vrot.slane %v568_v20, 2  ;;  %v649_v35 = vunpack.c.l.bf16 %v2958_v39  ;;  %v597_v45 = vsel %vm427_vm1, %v595_v33, %v596_v34  ;;  %v540_v58 = vsel %vm366_vm0, %v2882_v23, %v539_v44  ;;  %v1988_v28 = vld [vmem:[%s2590_s23 + $0x10] sm:$0xe]  ;;  %v2420_v34 = vld [vmem:[%s2975_s26 + $0x18] sm:$0xff]  }
  0x53   : > { %2287 = vmatprep.subr.bf16.mxu1 %v2405_v27  ;;  %1612 = vmatprep.mubr.bf16.mxu0 %v611_v4  ;;  %v599_v27 = vrot.slane %v500_v16, 2  ;;  %v629_v29 = vunpack.c.l.bf16 %v1975_v22  ;;  %v685_v38 = vrot.slane %v648_v31, 1  ;;  %v552_v62 = vpack.c.bf16 %v540_v58, %v537_v56  ;;  %v1991_v16 = vld [vmem:[%s2590_s23 + $0x28] sm:$0xe] }
  0x54   : > { %1677 = vmatprep.mubr.bf16.mxu1 %v700_v11  ;;  %v688_v49 = vrot.slane %v649_v35, 1  ;;  %v1979_v2 = vcombine.low %v2950_v19, %v1975_v22  ;;  %v733_v42 = vrot.slane %v644_v14, 2  ;;  %v739_v23 = vrot.slane %v646_v51, 2  ;;  %v1994_v19 = vld [vmem:[%s2590_s23 + $0x40] sm:$0xe]  ;;  %v2419_v39 = vld [vmem:[%s2975_s26 + $0x8] sm:$0xff]  }
  0x55   : > { %2251 = vmatpush3.bf16.msra.mxu0 %v2406_v53  ;;  %v687_v41 = vrot.slane %v629_v29, 1  ;;  %v600_v48 = vsel %vm427_vm1, %v598_v24, %v599_v27  ;;  %v686_v54 = vsel %vm366_vm0, %v684_v37, %v685_v38  ;;  %v742_v4 = vrot.slane %v647_v57, 2 }
  0x56   : > { %2295 = vmatpush3.bf16.msra.mxu1 %v2406_v53  ;;  %2252 = vmatprep.subr.bf16.mxu0 %v2408_v3  ;;  %v612_v53 = vpack.c.bf16 %v600_v48, %v597_v45  ;;  %v710_v0 = vunpack.c.l.bf16 %v1988_v28  ;;  %v711_v14 = vunpack.c.l.bf16 %v1989_v36  ;;  %v714_v51 = vunpack.c.l.bf16 %v1992_v46 }
  0x57   : > { %2288 = vmatprep.subr.bf16.mxu1 %v2408_v3  ;;  %v689_v61 = vsel %vm366_vm0, %v687_v41, %v688_v49  ;;  %v2417_v3 = vld [vmem:[%s2975_s26] sm:$0xff]   ;;  %v736_v6 = vrot.slane %v645_v15, 2  ;;  %v745_v10 = vrot.slane %v648_v31, 2  ;;  %v748_v30 = vrot.slane %v649_v35, 2 }
  0x58   : > { %1613 = vmatmul.mubr.bf16.gmra.mrb[24].mxu0 %v551_v40  ;;  %v701_v55 = vpack.c.bf16 %v689_v61, %v686_v54  ;;  %v738_v11 = vrot.slane %v714_v51, 2  ;;  %v712_v17 = vunpack.c.l.bf16 %v1990_v13  ;;  %v713_v18 = vunpack.c.l.bf16 %v1991_v16  ;;  %v1995_v40 = vld [vmem:[%s2590_s23 + $0x48] sm:$0xe] }
  0x59   : > { %1678 = vmatmul.mubr.bf16.gmra.mrb[24].mxu1 %v1978_v7  ;;  %2253 = vmatpush3.bf16.msra.mxu0 %v2409_v5  ;;  %v726_v7 = vrot.slane %v710_v0, 2  ;;  %v716_v21 = vunpack.c.l.bf16 %v1994_v19  ;;  %v717_v29 = vunpack.c.l.bf16 %v1995_v40 }
  0x5a   : > { %2296 = vmatpush3.bf16.msra.mxu1 %v2409_v5  ;;  %2254 = vmatprep.subr.bf16.mxu0 %v2410_v9  ;;  %v1993_v5 = vld [vmem:[%s2590_s23 + $0x38] sm:$0xe]  ;;  %v740_v20 = vsel %vm427_vm1, %v738_v11, %v739_v23  ;;  %v732_v27 = vrot.slane %v712_v17, 2 }
  0x5b   : > { %2289 = vmatprep.subr.bf16.mxu1 %v2410_v9  ;;  %1620 = vmatprep.mubr.bf16.mxu0 %v612_v53  ;;  %v715_v57 = vunpack.c.l.bf16 %v1993_v5  ;;  %v729_v9 = vrot.slane %v711_v14, 2  ;;  %v728_v1 = vsel %vm427_vm1, %v726_v7, %v2915_v59  ;;  %v735_v59 = vrot.slane %v713_v18, 2 }
  0x5c   : > { %1685 = vmatprep.mubr.bf16.mxu1 %v701_v55  ;;  %v744_v31 = vrot.slane %v716_v21, 2 }
  0x5d   : > { %2255 = vmatpush3.bf16.msra.mxu0 %v2411_v32  ;;  %v741_v12 = vrot.slane %v715_v57, 2  ;;  %v731_v15 = vsel %vm427_vm1, %v729_v9, %v2921_v63  ;;  %v747_v63 = vrot.slane %v717_v29, 2  ;;  %v737_v33 = vsel %vm427_vm1, %v735_v59, %v736_v6 }
  0x5e   : > { %2297 = vmatpush3.bf16.msra.mxu1 %v2411_v32  ;;  %2256 = vmatprep.subr.bf16.mxu0 %v2413_v50  ;;  %v758_v52 = vpack.c.bf16 %v731_v15, %v728_v1  ;;  %v734_v32 = vsel %vm427_vm1, %v732_v27, %v733_v42  ;;  %v746_v24 = vsel %vm427_vm1, %v744_v31, %v745_v10 }
  0x5f   : > { %2290 = vmatprep.subr.bf16.mxu1 %v2413_v50  ;;  %v743_v22 = vsel %vm427_vm1, %v741_v12, %v742_v4  ;;  %v749_v35 = vsel %vm427_vm1, %v747_v63, %v748_v30  ;;  %v759_v37 = vpack.c.bf16 %v737_v33, %v734_v32 }
  0x60   : > { %1621 = vmatmul.mubr.bf16.gmra.mrb[28].mxu0 %v552_v62  ;;  %v760_v8 = vpack.c.bf16 %v743_v22, %v740_v20  ;;  %v761_v38 = vpack.c.bf16 %v749_v35, %v746_v24 }
  0x61   : > { %1686 = vmatmul.mubr.bf16.gmra.mrb[28].mxu1 %v1979_v2  ;;  %2257 = vmatpush3.bf16.msra.mxu0 %v2414_v60 }
  0x62   : > { %2298 = vmatpush3.bf16.msra.mxu1 %v2414_v60  ;;  %2258 = vmatprep.subr.bf16.mxu0 %v2415_v25 }
  0x63   : > { %2291 = vmatprep.subr.bf16.mxu1 %v2415_v25  ;;  %1726 = vmatprep.mubr.bf16.mxu0 %v2417_v3 }
  0x64   : > { %1742 = vmatprep.mubr.bf16.mxu1 %v2418_v26 }
  0x65   : > { %2259 = vmatpush3.bf16.msra.mxu0 %v2416_v47 }
  0x66   : > { %2299 = vmatpush3.bf16.msra.mxu1 %v2416_v47 }
  0x68   : > { %1727 = vmatmul.mubr.bf16.vlgmr.msra.gmra.mrb[32].mxu0 %v758_v52 }
  0x69   : > { %1743 = vmatmul.mubr.bf16.vlgmr.msra.gmra.mrb[32].mxu1 %v760_v8  ;;  %1734 = vmatprep.mubr.bf16.mxu0 %v2419_v39 }
  0x6a   : > { %1750 = vmatprep.mubr.bf16.mxu1 %v2420_v34 }
  0x70   : > { %1735 = vmatmul.mubr.bf16.gmra.mrb[36].mxu0 %v759_v37 }
  0x71   : > { %1751 = vmatmul.mubr.bf16.gmra.mrb[36].mxu1 %v761_v38 }
  0xfb   : > { %v2100_v41 = vpop.f32.mrb[0].mxu0 }
  0xfc   : > { %v2101_v43 = vpop.f32.mrb[1].mxu0  ;;  %v2140_v44 = vpop.f32.mrb[0].mxu1 }
  0xfd   : > { %v2102_v45 = vadd.f32 %v2101_v43, %v2100_v41  ;;  %v2103_v48 = vpop.f32.mrb[2].mxu0  ;;  %v2141_v49 = vpop.f32.mrb[1].mxu1 }
  0xfe   : > { %v2104_v50 = vpop.f32.mrb[3].mxu0  ;;  %v2142_v53 = vadd.f32 %v2141_v49, %v2140_v44  ;;  %v2143_v54 = vpop.f32.mrb[2].mxu1 }
  0xff   : > { %v2105_v56 = vadd.f32 %v2104_v50, %v2103_v48  ;;  %v2144_v58 = vpop.f32.mrb[3].mxu1 }
 0x100   : > { %v1534_v60 = vadd.f32 %v2142_v53, %v2102_v45  ;;  %v2145_v61 = vadd.f32 %v2144_v58, %v2143_v54 }
 0x102   : > { %v1537_v62 = vadd.f32 %v2145_v61, %v2105_v56 }
 0x103   : > { %v2106_v2 = vpop.f32.mrb[4].mxu0 }
 0x104   : > { %v2107_v25 = vpop.f32.mrb[5].mxu0  ;;  %v2146_v42 = vpop.f32.mrb[4].mxu1 }
 0x105   : > { %v2108_v23 = vadd.f32 %v2107_v25, %v2106_v2  ;;  %v2109_v55 = vpop.f32.mrb[6].mxu0  ;;  %v2147_v3 = vpop.f32.mrb[5].mxu1 }
 0x106   : > { %v2110_v4 = vpop.f32.mrb[7].mxu0  ;;  %v2148_v26 = vadd.f32 %v2147_v3, %v2146_v42  ;;  %v2149_v28 = vpop.f32.mrb[6].mxu1 }
 0x107   : > { %v2111_v36 = vadd.f32 %v2110_v4, %v2109_v55  ;;  %v2150_v0 = vpop.f32.mrb[7].mxu1 }
 0x108   : > { %v1542_v14 = vadd.f32 %v2148_v26, %v2108_v23  ;;  %v2151_v46 = vadd.f32 %v2150_v0, %v2149_v28 }
 0x10a   : > { %v1545_v5 = vadd.f32 %v2151_v46, %v2111_v36 }
 0x10b   : > { %v2112_v47 = vpop.f32.mrb[8].mxu0 }
 0x10c   : > { %v2113_v51 = vpop.f32.mrb[9].mxu0  ;;  %v2152_v57 = vpop.f32.mrb[8].mxu1 }
 0x10d   : > { %v2114_v6 = vadd.f32 %v2113_v51, %v2112_v47  ;;  %v2115_v7 = vpop.f32.mrb[10].mxu0  ;;  %v2153_v9 = vpop.f32.mrb[9].mxu1 }
 0x10e   : > { %v2116_v10 = vpop.f32.mrb[11].mxu0  ;;  %v2154_v30 = vadd.f32 %v2153_v9, %v2152_v57  ;;  %v2155_v11 = vpop.f32.mrb[10].mxu1 }
 0x10f   : > { %v2117_v12 = vadd.f32 %v2116_v10, %v2115_v7  ;;  %v2156_v13 = vpop.f32.mrb[11].mxu1 }
 0x110   : > { %v1550_v16 = vadd.f32 %v2154_v30, %v2114_v6  ;;  %v2157_v1 = vadd.f32 %v2156_v13, %v2155_v11 }
 0x112   : > { %v1553_v15 = vadd.f32 %v2157_v1, %v2117_v12 }
 0x113   : > { %v2118_v17 = vpop.f32.mrb[12].mxu0 }
 0x114   : > { %v2158_v18 = vpop.f32.mrb[12].mxu1  ;;  %v2119_v19 = vpop.f32.mrb[13].mxu0 }
 0x115   : > { %v2120_v40 = vadd.f32 %v2119_v19, %v2118_v17  ;;  %v2159_v52 = vpop.f32.mrb[13].mxu1  ;;  %v2121_v20 = vpop.f32.mrb[14].mxu0 }
 0x116   : > { %v2160_v22 = vadd.f32 %v2159_v52, %v2158_v18  ;;  %v2161_v21 = vpop.f32.mrb[14].mxu1  ;;  %v2122_v8 = vpop.f32.mrb[15].mxu0 }
 0x117   : > { %v2123_v39 = vadd.f32 %v2122_v8, %v2121_v20  ;;  %v2162_v34 = vpop.f32.mrb[15].mxu1 }
 0x118   : > { %v1558_v27 = vadd.f32 %v2160_v22, %v2120_v40  ;;  %v2163_v59 = vadd.f32 %v2162_v34, %v2161_v21 }
 0x11a   : > { %v3023_v29 = vadd.f32 %v2163_v59, %v2123_v39 }
 0x11b   : > { %v2180_v31 = vpop.f32.mrb[16].mxu0 }
 0x11c   : > { %v2220_v63 = vpop.f32.mrb[16].mxu1  ;;  %v2181_v32 = vpop.f32.mrb[17].mxu0 }
 0x11d   : > { %v2182_v33 = vadd.f32 %v2181_v32, %v2180_v31  ;;  %v2221_v24 = vpop.f32.mrb[17].mxu1  ;;  %v2183_v35 = vpop.f32.mrb[18].mxu0 }
 0x11e   : > { %v2222_v37 = vadd.f32 %v2221_v24, %v2220_v63  ;;  %v2223_v38 = vpop.f32.mrb[18].mxu1  ;;  %v2184_v41 = vpop.f32.mrb[19].mxu0 }
 0x11f   : > { %v1599_v43 = vadd.f32 %v2182_v33, %v1534_v60  ;;  %v2185_v44 = vadd.f32 %v2184_v41, %v2183_v35  ;;  %v2224_v45 = vpop.f32.mrb[19].mxu1 }
 0x120   : > { %v2225_v48 = vadd.f32 %v2224_v45, %v2223_v38 }
 0x121   : > { %v3025_v49 = vadd.f32 %v2222_v37, %v1599_v43  ;;  %v1602_v50 = vadd.f32 %v2185_v44, %v1537_v62  ;;  %v2080_v44 = vld [vmem:[%s3069_s2] ss:$0 sm:$0xff] }
 0x123   : > { %v3027_v53 = vadd.f32 %v2225_v48, %v1602_v50  ;;  %v2186_v54 = vpop.f32.mrb[20].mxu0 }
 0x124   : > { %v2226_v56 = vpop.f32.mrb[20].mxu1  ;;  %v2187_v58 = vpop.f32.mrb[21].mxu0 }
 0x125   : > { %v2188_v61 = vadd.f32 %v2187_v58, %v2186_v54  ;;  %v2227_v2 = vpop.f32.mrb[21].mxu1  ;;  %v2189_v25 = vpop.f32.mrb[22].mxu0 }
 0x126   : > { %v2228_v42 = vadd.f32 %v2227_v2, %v2226_v56  ;;  %v2229_v23 = vpop.f32.mrb[22].mxu1  ;;  %v2190_v55 = vpop.f32.mrb[23].mxu0  ;;  %v2081_v56 = vld [vmem:[%s3070_s3] ss:$0 sm:$0xff] }
 0x127   : > { %v1607_v3 = vadd.f32 %v2188_v61, %v1542_v14  ;;  %v2191_v4 = vadd.f32 %v2190_v55, %v2189_v25  ;;  %v2230_v60 = vpop.f32.mrb[23].mxu1 }
 0x128   : > { %v2231_v26 = vadd.f32 %v2230_v60, %v2229_v23 }
 0x129   : > { %v3029_v28 = vadd.f32 %v2228_v42, %v1607_v3  ;;  %v1610_v36 = vadd.f32 %v2191_v4, %v1545_v5 }
 0x12b   : > { %v3031_v0 = vadd.f32 %v2231_v26, %v1610_v36  ;;  %v2192_v62 = vpop.f32.mrb[24].mxu0 }
 0x12c   : > { %v2232_v46 = vpop.f32.mrb[24].mxu1  ;;  %v2193_v47 = vpop.f32.mrb[25].mxu0 }
 0x12d   : > { %v2233_v51 = vpop.f32.mrb[25].mxu1  ;;  %v2194_v57 = vadd.f32 %v2193_v47, %v2192_v62  ;;  %v2195_v7 = vpop.f32.mrb[26].mxu0 }
 0x12e   : > { %v2234_v6 = vadd.f32 %v2233_v51, %v2232_v46  ;;  %v2235_v9 = vpop.f32.mrb[26].mxu1  ;;  %v2196_v10 = vpop.f32.mrb[27].mxu0 }
 0x12f   : > { %v2236_v30 = vpop.f32.mrb[27].mxu1  ;;  %v1615_v11 = vadd.f32 %v2194_v57, %v1550_v16  ;;  %v2197_v14 = vadd.f32 %v2196_v10, %v2195_v7 }
 0x130   : > { %v2237_v12 = vadd.f32 %v2236_v30, %v2235_v9 }
 0x131   : > { %v1680_v13 = vadd.f32 %v2234_v6, %v1615_v11  ;;  %v1618_v1 = vadd.f32 %v2197_v14, %v1553_v15 }
 0x133   : > { %v1683_v17 = vadd.f32 %v2237_v12, %v1618_v1  ;;  %v2198_v18 = vpop.f32.mrb[28].mxu0 }
 0x134   : > { %v2238_v5 = vpop.f32.mrb[28].mxu1  ;;  %v2199_v19 = vpop.f32.mrb[29].mxu0 }
 0x135   : > { %v2239_v40 = vpop.f32.mrb[29].mxu1  ;;  %v2200_v52 = vadd.f32 %v2199_v19, %v2198_v18  ;;  %v2201_v22 = vpop.f32.mrb[30].mxu0 }
 0x136   : > { %v2240_v20 = vadd.f32 %v2239_v40, %v2238_v5  ;;  %v2241_v21 = vpop.f32.mrb[30].mxu1  ;;  %v2202_v8 = vpop.f32.mrb[31].mxu0 }
 0x137   : > { %v2242_v39 = vpop.f32.mrb[31].mxu1  ;;  %v1623_v34 = vadd.f32 %v2200_v52, %v1558_v27  ;;  %v2203_v59 = vadd.f32 %v2202_v8, %v2201_v22 }
 0x138   : > { %v2243_v31 = vadd.f32 %v2242_v39, %v2241_v21 }
 0x139   : > { %v1688_v16 = vadd.f32 %v2240_v20, %v1623_v34  ;;  %v1626_v63 = vadd.f32 %v2203_v59, %v3023_v29 }
 0x13b   : > { %v1691_v32 = vadd.f32 %v2243_v31, %v1626_v63  ;;  %v2260_v15 = vpop.f32.mrb[32].mxu0 }
 0x13c   : > { %v2272_v33 = vpop.f32.mrb[32].mxu1  ;;  %v2261_v24 = vpop.f32.mrb[33].mxu0 }
 0x13d   : > { %v2273_v35 = vpop.f32.mrb[33].mxu1  ;;  %v2262_v37 = vadd.f32 %v2261_v24, %v2260_v15  ;;  %v2263_v41 = vpop.f32.mrb[34].mxu0 }
 0x13e   : > { %v2274_v38 = vadd.f32 %v2273_v35, %v2272_v33  ;;  %v2275_v43 = vpop.f32.mrb[34].mxu1  ;;  %v2264_v27 = vpop.f32.mrb[35].mxu0 }
 0x13f   : > { %v2276_v45 = vpop.f32.mrb[35].mxu1  ;;  %v1729_v48 = vadd.f32 %v2262_v37, %v3025_v49  ;;  %v2265_v29 = vadd.f32 %v2264_v27, %v2263_v41 }
 0x140   : > { %v1745_v50 = vadd.f32 %v2274_v38, %v1680_v13  ;;  %v2277_v54 = vadd.f32 %v2276_v45, %v2275_v43 }
 0x141   : > { %v1766_v58 = vmul.f32 %v2080_v44, %v1729_v48  ;;  %v1732_v2 = vadd.f32 %v2265_v29, %v3027_v53 }
 0x142   : > { %v1770_v61 = vmul.f32 %v2080_v44, %v1745_v50  ;;  %v1748_v25 = vadd.f32 %v2277_v54, %v1683_v17 }
 0x143   : > { %v1781_v49 = vadd.f32 %v2081_v56, %v1766_v58  ;;  %v1767_v23 = vmul.f32 %v2080_v44, %v1732_v2  ;;  %v2266_v3 = vpop.f32.mrb[36].mxu0 }
 0x144   : > { %v1785_v42 = vadd.f32 %v2081_v56, %v1770_v61  ;;  %v1771_v55 = vmul.f32 %v2080_v44, %v1748_v25  ;;  %v2278_v4 = vpop.f32.mrb[36].mxu1  ;;  %v2267_v60 = vpop.f32.mrb[37].mxu0 }
 0x145   : > { %v2279_v26 = vpop.f32.mrb[37].mxu1  ;;  %1789 = vst [vmem:[%s3046_s13] sm:$0xff] %v1781_v49  ;;  %v1782_v53 = vadd.f32 %v2081_v56, %v1767_v23  ;;  %v2268_v62 = vadd.f32 %v2267_v60, %v2266_v3  ;;  %v2269_v47 = vpop.f32.mrb[38].mxu0 }
 0x146   : > { %1793 = vst [vmem:[%s3046_s13 + $0x20] sm:$0xff] %v1785_v42  ;;  %v1786_v36 = vadd.f32 %v2081_v56, %v1771_v55  ;;  %v2280_v46 = vadd.f32 %v2279_v26, %v2278_v4  ;;  %v2281_v51 = vpop.f32.mrb[38].mxu1  ;;  %v2270_v57 = vpop.f32.mrb[39].mxu0 }
 0x147   : > { %v2282_v6 = vpop.f32.mrb[39].mxu1  ;;  %1790 = vst [vmem:[%s3046_s13 + $0x8] sm:$0xff] %v1782_v53  ;;  %v1737_v7 = vadd.f32 %v2268_v62, %v3029_v28  ;;  %v2271_v10 = vadd.f32 %v2270_v57, %v2269_v47 }
 0x148   : > { %1794 = vst [vmem:[%s3046_s13 + $0x28] sm:$0xff] %v1786_v36  ;;  %v1753_v9 = vadd.f32 %v2280_v46, %v1688_v16  ;;  %v2283_v30 = vadd.f32 %v2282_v6, %v2281_v51 }
 0x149   : > { %v1768_v11 = vmul.f32 %v2080_v44, %v1737_v7  ;;  %v1740_v12 = vadd.f32 %v2271_v10, %v3031_v0 }
 0x14a   : > { %v1772_v14 = vmul.f32 %v2080_v44, %v1753_v9  ;;  %v1756_v13 = vadd.f32 %v2283_v30, %v1691_v32 }
 0x14b   : > { %v1783_v1 = vadd.f32 %v2081_v56, %v1768_v11  ;;  %v1769_v18 = vmul.f32 %v2080_v44, %v1740_v12 }
 0x14c   : > { %v1787_v17 = vadd.f32 %v2081_v56, %v1772_v14  ;;  %v1773_v5 = vmul.f32 %v2080_v44, %v1756_v13 }
 0x14d   : > { %1791 = vst [vmem:[%s3046_s13 + $0x10] sm:$0xff] %v1783_v1  ;;  %v1784_v19 = vadd.f32 %v2081_v56, %v1769_v18 }
 0x14e   : > { %1795 = vst [vmem:[%s3046_s13 + $0x30] sm:$0xff] %v1787_v17  ;;  %v1788_v40 = vadd.f32 %v2081_v56, %v1773_v5 }
 0x14f   : > { %1792 = vst [vmem:[%s3046_s13 + $0x18] sm:$0xff] %v1784_v19 }
 0x150   : > { %1796 = vst [vmem:[%s3046_s13 + $0x38] sm:$0xff] %v1788_v40 }
 0x151 PF: > { %s15_s20 = sadd.s32 1, %s2443_s20   ;;  %s3074_s18 = smov %s2439_s19 }
 0x152   : > { %p12_p6 = scmp.ge.s32.totalorder %s15_s20, 4   ;;  %s3075_s19 = smov %s3077_s21 }
 0x154   :  { %14 = sbr.rel (!%p12_p6) target bundleno = 2 (0x2), region = 84 }

</bundles_post_ra>
